<compile_context>
chip_gen: v5e
topology: v5e:2x2
jax: 0.10.0
libtpu: 0.0.40
codegen_flags: <defaults>
</compile_context>

<pallas_src>
from functools import partial

import jax
import jax.numpy as jnp
from jax.experimental import pallas as pl
from jax.experimental.pallas import tpu as pltpu

E_CHAR = 50          # fixed in the module (__init__: self.e_char = 50)
KERNEL_K = 5         # standard CS224n CNN kernel width


def _round_up(x, m):
    return (x + m - 1) // m * m


def _char_cnn_highway_kernel(x_ref, wc_ref, bc_ref, wp_ref, bp_ref,
                             wg_ref, bg_ref, o_ref, *, l_pad, m_sub):
    """One block of m_blk words, processed in chunks of m_sub words.

    x_ref : (m_blk * l_pad, KC_pad)  bf16   im2col'd char embeddings (zero-padded K*C)
    wc_ref: (KC_pad, E)              bf16   conv weight (im2col layout, zero-padded rows)
    bc_ref: (1, E) f32,  wp/wg: (E, E) bf16,  bp/bg: (1, E) f32
    o_ref : (m_blk, E) f32
    """
    m_blk, e = o_ref.shape

    # Grid-invariant weights: load once per grid step.
    wc = wc_ref[...]
    wp = wp_ref[...]
    wg = wg_ref[...]
    bc = bc_ref[...]
    bp = bp_ref[...]
    bg = bg_ref[...]

    for c in range(m_blk // m_sub):
        rows = pl.ds(c * m_sub * l_pad, m_sub * l_pad)
        # Conv1d(e_char -> E, k=5) as ONE matmul per chunk, f32 accumulation.
        conv = jnp.dot(x_ref[rows, :], wc, preferred_element_type=jnp.float32)

        # Max-pool over character positions BEFORE bias+ReLU.
        # Exact: bias is per-column (position-invariant) and ReLU is monotone;
        # padded rows are edge-duplicates so the max is unchanged.
        pooled = jnp.max(conv.reshape(m_sub, l_pad, e), axis=1)       # (m_sub, E)
        pooled = jnp.maximum(pooled + bc, 0.0)                        # ReLU, f32

        # Highway: proj = relu(h Wp + bp); gate = sigmoid(h Wg + bg)
        pooled_bf = pooled.astype(jnp.bfloat16)
        proj = jnp.maximum(
            jnp.dot(pooled_bf, wp, preferred_element_type=jnp.float32) + bp, 0.0)
        gate = jax.nn.sigmoid(
            jnp.dot(pooled_bf, wg, preferred_element_type=jnp.float32) + bg)

        o_ref[pl.ds(c * m_sub, m_sub), :] = (
            gate * proj + (1.0 - gate) * pooled).astype(o_ref.dtype)


def model_embeddings_forward(input_ids, params, *, m_blk=None):
    """input_ids: (sent_len, batch, max_word_len) int32 -> (sent_len, batch, embed_size)."""
    S, B, L = input_ids.shape
    V, C = params["emb"].shape
    K = KERNEL_K
    E = params["w_conv"].shape[2]
    L_out = L - K + 1
    assert L_out >= 1, "max_word_len must be >= kernel width"
    L_pad = _round_up(L_out, 8)              # sublane-aligned pool window
    KC = K * C
    KC_pad = _round_up(KC, 128)              # 250 -> 256: unmasked lanes / clean MXU pass
    M = S * B

    if m_blk is None:
        bytes_per_word = L_pad * KC_pad * 2                      # bf16 x rows per word
        # ~2 MB bf16 x block per grid step (review target: 1-4 MB).
        m_blk = max(8, ((2 << 20) // bytes_per_word) // 8 * 8)
        # v7x VMEM cap: double-buffered x block <= ~8 MB.
        m_blk = min(m_blk, max(8, ((8 << 20) // (2 * bytes_per_word)) // 8 * 8))
        # Keep >= 4 grid blocks when M allows (2 TC megacore on v7x + pipelining).
        m_blk = min(m_blk, _round_up(max(M // 4, 1), 8))
        # Never exceed the (padded) problem size.
        m_blk = min(m_blk, _round_up(M, 8))
    assert m_blk % 8 == 0
    M_pad = _round_up(M, m_blk)

    # In-kernel chunking: bound the f32 conv intermediate to ~1024 rows.
    m_sub = m_blk
    while m_sub > 8 and m_sub * L_pad > 1024 and m_sub % 16 == 0:
        m_sub //= 2

    # --- plain-JAX glue: single gather + im2col (K shifted slices) -----------
    emb_bf = params["emb"].astype(jnp.bfloat16)                   # (V, C)
    ids2 = input_ids.reshape(M, L)
    x_emb = emb_bf[ids2]                                          # (M, L, C) — gathered ONCE
    x_col = jnp.concatenate(
        [x_emb[:, j:j + L_out, :] for j in range(K)], axis=-1)    # (M, L_out, K*C)
    if KC_pad != KC:     # zero-pad contraction dim (zeros contribute 0 to the dot)
        x_col = jnp.pad(x_col, ((0, 0), (0, 0), (0, KC_pad - KC)))
    if L_pad != L_out:   # duplicate last valid position: max-pool unchanged
        x_col = jnp.pad(x_col, ((0, 0), (0, L_pad - L_out), (0, 0)), mode="edge")
    if M_pad != M:       # padded words are discarded after the kernel
        x_col = jnp.pad(x_col, ((0, M_pad - M), (0, 0), (0, 0)))
    x_flat = x_col.reshape(M_pad * L_pad, KC_pad)                 # bf16

    w_col = params["w_conv"].reshape(KC, E)
    if KC_pad != KC:
        w_col = jnp.pad(w_col, ((0, KC_pad - KC), (0, 0)))        # zero rows
    w_col = w_col.astype(jnp.bfloat16)
    wp = params["w_proj"].astype(jnp.bfloat16)
    wg = params["w_gate"].astype(jnp.bfloat16)

    # Grid-invariant operands: single-buffered (no pipelining benefit).
    def const_spec(a):
        return pl.BlockSpec(a.shape, lambda i: (0, 0),
                            pipeline_mode=pl.Buffered(1))

    grid = (M_pad // m_blk,)

    # VMEM budget estimate -> explicit limit (>= default 32 MiB, v7x-safe).
    est_vmem = (2 * m_blk * L_pad * KC_pad * 2        # x double buffer (bf16)
                + 2 * m_blk * E * 4                   # out double buffer (f32)
                + (KC_pad * E + 2 * E * E) * 2        # weights (bf16, single buffer)
                + 2 * m_sub * L_pad * E * 4           # conv intermediate + slack
                + (1 << 20))                          # headroom
    vmem_limit = int(min(max(2 * est_vmem, 32 << 20), 120 << 20))

    out = pl.pallas_call(
        partial(_char_cnn_highway_kernel, l_pad=L_pad, m_sub=m_sub),
        out_shape=jax.ShapeDtypeStruct((M_pad, E), jnp.float32),
        grid_spec=pltpu.PrefetchScalarGridSpec(
            num_scalar_prefetch=0,
            grid=grid,
            in_specs=[
                pl.BlockSpec((m_blk * L_pad, KC_pad), lambda i: (i, 0)),
                const_spec(w_col),
                const_spec(params["b_conv"]),
                const_spec(wp),
                const_spec(params["b_proj"]),
                const_spec(wg),
                const_spec(params["b_gate"]),
            ],
            out_specs=pl.BlockSpec((m_blk, E), lambda i: (i, 0)),
        ),
        compiler_params=pltpu.CompilerParams(
            dimension_semantics=("parallel",),
            vmem_limit_bytes=vmem_limit),
    )(x_flat, w_col, params["b_conv"], wp, params["b_proj"], wg,
      params["b_gate"])

    return out[:M].reshape(S, B, E)


def reference_forward(input_ids, params):
    """Pure-JAX (f32) reference with the original op order (relu before pool)."""
    x = params["emb"][input_ids]                    # (S, B, L, C)
    S, B, L, C = x.shape
    E = params["w_conv"].shape[2]
    L_out = L - KERNEL_K + 1
    conv = jnp.zeros((S, B, L_out, E), jnp.float32)
    for j in range(KERNEL_K):
        conv = conv + jnp.einsum("sblc,ce->sble",
                                 x[:, :, j:j + L_out, :], params["w_conv"][j])
    conv = jax.nn.relu(conv + params["b_conv"][0])
    pooled = jnp.max(conv, axis=2)                  # (S, B, E)
    proj = jax.nn.relu(pooled @ params["w_proj"] + params["b_proj"][0])
    gate = jax.nn.sigmoid(pooled @ params["w_gate"] + params["b_gate"][0])
    return gate * proj + (1.0 - gate) * pooled


def init_params(key, char_vocab_size, embed_size, pad_idx=0):
    ks = jax.random.split(key, 6)
    emb = 0.1 * jax.random.normal(ks[0], (char_vocab_size, E_CHAR), jnp.float32)
    emb = emb.at[pad_idx].set(0.0)                  # nn.Embedding padding_idx row = 0
    return {
        "emb": emb,
        "w_conv": 0.1 * jax.random.normal(ks[1], (KERNEL_K, E_CHAR, embed_size), jnp.float32),
        "b_conv": 0.1 * jax.random.normal(ks[2], (1, embed_size), jnp.float32),
        "w_proj": 0.1 * jax.random.normal(ks[3], (embed_size, embed_size), jnp.float32),
        "b_proj": 0.1 * jax.random.normal(ks[4], (1, embed_size), jnp.float32),
        "w_gate": 0.1 * jax.random.normal(ks[5], (embed_size, embed_size), jnp.float32),
        "b_gate": jnp.zeros((1, embed_size), jnp.float32),
    }


if __name__ == "__main__":
    key = jax.random.PRNGKey(0)
    k_params, k_ids = jax.random.split(key)

    sent_len, batch, max_word_len = 6, 4, 11
    char_vocab, embed_size = 30, 256          # E=256 -> lane-dense output

    params = init_params(k_params, char_vocab, embed_size, pad_idx=0)
    input_ids = jax.random.randint(
        k_ids, (sent_len, batch, max_word_len), 0, char_vocab, dtype=jnp.int32)

    out = model_embeddings_forward(input_ids, params)
    out = jax.block_until_ready(out)

    ref = reference_forward(input_ids, params)
    assert out.shape == (sent_len, batch, embed_size)
    # bf16 matmul operands (f32 accumulation) -> loosened tolerance vs f32 ref.
    assert jnp.allclose(out, ref, atol=2e-2, rtol=2e-2), "mismatch vs JAX reference"

    print("KERNEL_OK")
</pallas_src>

<mosaic_0001>
module attributes {stable_mosaic.version = 11 : i64} {
  func.func @_char_cnn_highway_kernel(%arg0: i32, %arg1: memref<64x256xbf16, #tpu.memory_space<vmem>>, %arg2: memref<256x256xbf16, #tpu.memory_space<vmem>>, %arg3: memref<1x256xf32, #tpu.memory_space<vmem>>, %arg4: memref<256x256xbf16, #tpu.memory_space<vmem>>, %arg5: memref<1x256xf32, #tpu.memory_space<vmem>>, %arg6: memref<256x256xbf16, #tpu.memory_space<vmem>>, %arg7: memref<1x256xf32, #tpu.memory_space<vmem>>, %arg8: memref<8x256xf32, #tpu.memory_space<vmem>>) attributes {dimension_semantics = [#tpu.dimension_semantics<parallel>], iteration_bounds = array<i64: 3>, scalar_prefetch = 0 : i64, scratch_operands = 0 : i64, tpu.core_type = #tpu.core_type<tc>, window_params = [{transform_indices = @transform_0, window_bounds = array<i64: 64, 256>}, {pipeline_mode = #tpu.pipeline_mode<synchronous>, transform_indices = @transform_1, window_bounds = array<i64: 256, 256>}, {pipeline_mode = #tpu.pipeline_mode<synchronous>, transform_indices = @transform_2, window_bounds = array<i64: 1, 256>}, {pipeline_mode = #tpu.pipeline_mode<synchronous>, transform_indices = @transform_3, window_bounds = array<i64: 256, 256>}, {pipeline_mode = #tpu.pipeline_mode<synchronous>, transform_indices = @transform_4, window_bounds = array<i64: 1, 256>}, {pipeline_mode = #tpu.pipeline_mode<synchronous>, transform_indices = @transform_5, window_bounds = array<i64: 256, 256>}, {pipeline_mode = #tpu.pipeline_mode<synchronous>, transform_indices = @transform_6, window_bounds = array<i64: 1, 256>}, {transform_indices = @transform_7, window_bounds = array<i64: 8, 256>}]} {
    %c0 = arith.constant 0 : index
    %c0_0 = arith.constant 0 : index
    %0 = vector.load %arg2[%c0, %c0_0] : memref<256x256xbf16, #tpu.memory_space<vmem>>, vector<256x256xbf16>
    %c0_1 = arith.constant 0 : index
    %c0_2 = arith.constant 0 : index
    %1 = vector.load %arg4[%c0_1, %c0_2] : memref<256x256xbf16, #tpu.memory_space<vmem>>, vector<256x256xbf16>
    %c0_3 = arith.constant 0 : index
    %c0_4 = arith.constant 0 : index
    %2 = vector.load %arg6[%c0_3, %c0_4] : memref<256x256xbf16, #tpu.memory_space<vmem>>, vector<256x256xbf16>
    %c0_5 = arith.constant 0 : index
    %c0_6 = arith.constant 0 : index
    %3 = vector.load %arg3[%c0_5, %c0_6] : memref<1x256xf32, #tpu.memory_space<vmem>>, vector<1x256xf32>
    %c0_7 = arith.constant 0 : index
    %c0_8 = arith.constant 0 : index
    %4 = vector.load %arg5[%c0_7, %c0_8] : memref<1x256xf32, #tpu.memory_space<vmem>>, vector<1x256xf32>
    %c0_9 = arith.constant 0 : index
    %c0_10 = arith.constant 0 : index
    %5 = vector.load %arg7[%c0_9, %c0_10] : memref<1x256xf32, #tpu.memory_space<vmem>>, vector<1x256xf32>
    %c0_11 = arith.constant 0 : index
    %c0_12 = arith.constant 0 : index
    %6 = vector.load %arg1[%c0_11, %c0_12] : memref<64x256xbf16, #tpu.memory_space<vmem>>, vector<64x256xbf16>
    %cst = arith.constant dense<0.000000e+00> : vector<64x256xf32>
    %7 = tpu.matmul %6, %0, %cst {dimension_numbers = #tpu.dot_dimension_numbers<[1], [0], [0], [1], [0, 0, 1, 1], [], []>} : vector<64x256xbf16>, vector<256x256xbf16>, vector<64x256xf32> -> vector<64x256xf32>
    %8 = vector.shape_cast %7 : vector<64x256xf32> to vector<8x8x256xf32>
    %cst_13 = arith.constant dense<0xFF800000> : vector<8x256xf32>
    %9 = vector.multi_reduction <maximumf>, %8, %cst_13 [1] : vector<8x8x256xf32> to vector<8x256xf32>
    %10 = vector.broadcast %3 : vector<1x256xf32> to vector<8x256xf32>
    %11 = arith.addf %9, %10 : vector<8x256xf32>
    %cst_14 = arith.constant 0.000000e+00 : f32
    %12 = vector.broadcast %cst_14 : f32 to vector<8x256xf32>
    %13 = arith.maximumf %11, %12 : vector<8x256xf32>
    %14 = arith.truncf %13 : vector<8x256xf32> to vector<8x256xbf16>
    %cst_15 = arith.constant dense<0.000000e+00> : vector<8x256xf32>
    %15 = tpu.matmul %14, %1, %cst_15 {dimension_numbers = #tpu.dot_dimension_numbers<[1], [0], [0], [1], [0, 0, 1, 1], [], []>} : vector<8x256xbf16>, vector<256x256xbf16>, vector<8x256xf32> -> vector<8x256xf32>
    %16 = vector.broadcast %4 : vector<1x256xf32> to vector<8x256xf32>
    %17 = arith.addf %15, %16 : vector<8x256xf32>
    %cst_16 = arith.constant 0.000000e+00 : f32
    %18 = vector.broadcast %cst_16 : f32 to vector<8x256xf32>
    %19 = arith.maximumf %17, %18 : vector<8x256xf32>
    %cst_17 = arith.constant dense<0.000000e+00> : vector<8x256xf32>
    %20 = tpu.matmul %14, %2, %cst_17 {dimension_numbers = #tpu.dot_dimension_numbers<[1], [0], [0], [1], [0, 0, 1, 1], [], []>} : vector<8x256xbf16>, vector<256x256xbf16>, vector<8x256xf32> -> vector<8x256xf32>
    %21 = vector.broadcast %5 : vector<1x256xf32> to vector<8x256xf32>
    %22 = arith.addf %20, %21 : vector<8x256xf32>
    %23 = arith.negf %22 : vector<8x256xf32>
    %24 = math.exp %23 : vector<8x256xf32>
    %cst_18 = arith.constant 1.000000e+00 : f32
    %25 = vector.broadcast %cst_18 : f32 to vector<8x256xf32>
    %26 = arith.addf %25, %24 : vector<8x256xf32>
    %27 = arith.divf %25, %26 : vector<8x256xf32>
    %28 = arith.mulf %27, %19 : vector<8x256xf32>
    %cst_19 = arith.constant 1.000000e+00 : f32
    %29 = vector.broadcast %cst_19 : f32 to vector<8x256xf32>
    %30 = arith.subf %29, %27 : vector<8x256xf32>
    %31 = arith.mulf %30, %13 : vector<8x256xf32>
    %32 = arith.addf %28, %31 : vector<8x256xf32>
    %c0_20 = arith.constant 0 : index
    %c0_21 = arith.constant 0 : index
    %33 = vector.load %arg8[%c0_20, %c0_21] : memref<8x256xf32, #tpu.memory_space<vmem>>, vector<8x256xf32>
    tpu.vector_store %arg8[%c0_20, %c0_21], %32 {strides = array<i32>} : memref<8x256xf32, #tpu.memory_space<vmem>>, vector<8x256xf32>,
    return
  }
  func.func @transform_0(%arg0: i32) -> (i32, i32) {
    %c0_i32 = arith.constant 0 : i32
    %c0_i32_0 = arith.constant 0 : i32
    return %arg0, %c0_i32 : i32, i32
  }
  func.func @transform_1(%arg0: i32) -> (i32, i32) {
    %c0_i32 = arith.constant 0 : i32
    %c0_i32_0 = arith.constant 0 : i32
    %c0_i32_1 = arith.constant 0 : i32
    return %c0_i32, %c0_i32_0 : i32, i32
  }
  func.func @transform_2(%arg0: i32) -> (i32, i32) {
    %c0_i32 = arith.constant 0 : i32
    %c0_i32_0 = arith.constant 0 : i32
    %c0_i32_1 = arith.constant 0 : i32
    return %c0_i32, %c0_i32_0 : i32, i32
  }
  func.func @transform_3(%arg0: i32) -> (i32, i32) {
    %c0_i32 = arith.constant 0 : i32
    %c0_i32_0 = arith.constant 0 : i32
    %c0_i32_1 = arith.constant 0 : i32
    return %c0_i32, %c0_i32_0 : i32, i32
  }
  func.func @transform_4(%arg0: i32) -> (i32, i32) {
    %c0_i32 = arith.constant 0 : i32
    %c0_i32_0 = arith.constant 0 : i32
    %c0_i32_1 = arith.constant 0 : i32
    return %c0_i32, %c0_i32_0 : i32, i32
  }
  func.func @transform_5(%arg0: i32) -> (i32, i32) {
    %c0_i32 = arith.constant 0 : i32
    %c0_i32_0 = arith.constant 0 : i32
    %c0_i32_1 = arith.constant 0 : i32
    return %c0_i32, %c0_i32_0 : i32, i32
  }
  func.func @transform_6(%arg0: i32) -> (i32, i32) {
    %c0_i32 = arith.constant 0 : i32
    %c0_i32_0 = arith.constant 0 : i32
    %c0_i32_1 = arith.constant 0 : i32
    return %c0_i32, %c0_i32_0 : i32, i32
  }
  func.func @transform_7(%arg0: i32) -> (i32, i32) {
    %c0_i32 = arith.constant 0 : i32
    %c0_i32_0 = arith.constant 0 : i32
    return %arg0, %c0_i32 : i32, i32
  }
}

</mosaic_0001>

<bundles_post_ra>
// kernel: tpu_custom_call.1
= control target key start
LH: loop header
LB: loop body
LE: loop exit
PB: predicated region body
PF: predicated region fallthrough
CT: control target
= control target key end

     0   :  { %s2922_s0 = inlined_call_operand.hbm [shape: bf16[192,256], index: 0, kind: input, shape index: {}]   ;;  %s2923_s1 = inlined_call_operand.hbm [shape: bf16[256,256], index: 1, kind: input, shape index: {}]   ;;  %s2924_s2 = inlined_call_operand.hbm [shape: f32[1,256], index: 2, kind: input, shape index: {}]   ;;  %s2925_s3 = inlined_call_operand.hbm [shape: bf16[256,256], index: 3, kind: input, shape index: {}]   ;;  %s2926_s4 = inlined_call_operand.vmem [shape: f32[1,256], index: 4, kind: input, shape index: {}]   ;;  %s2927_s5 = inlined_call_operand.hbm [shape: bf16[256,256], index: 5, kind: input, shape index: {}]   ;;  %s2928_s6 = inlined_call_operand.vmem [shape: f32[1,256], index: 6, kind: input, shape index: {}]   ;;  %s2929_s7 = inlined_call_operand.hbm [shape: f32[24,256], index: 7, kind: output, shape index: {}]  }
   0x1   :  { %2932 = sst [smem:[#allocation16_spill]] %s2923_s1 }
   0x2   :  { %12 = vsyncpa [#allocation3], 0 }
   0x3   :  { %14 = vsyncpa [#allocation3 + $0x1], 0 }
   0x4   :  { %15 = vsyncpa [#allocation6], 0 }
   0x5   :  { %16 = vsyncpa [#allocation9], 0 }
   0x6   :  { %17 = vsyncpa [#allocation4], 0 }
   0x7   :  { %19 = vsyncpa [#allocation4 + $0x1], 0  ;;  %s2580_s24 = smov 0   ;;  %s2582_s25 = smov 0  }
   0x8   :  { %s2584_s26 = smov 0   ;;  %s2586_s27 = smov 0  }
   0x9 LB: > { %s2601_s28 = sadd.s32 4294967295, %s2532_s27   ;;  %s1663_s29 = sadd.s32 4294967294, %s2532_s27   ;;  %s2532_s27 = sphi %s2586_s27, %s2945_s27   ;;  %s2528_s26 = sphi %s2584_s26, %s2944_s26   ;;  %s2524_s25 = sphi %s2582_s25, %s2943_s25   ;;  %s2520_s24 = sphi %s2580_s24, %s2942_s24  }
   0xa   : > { %p45_p0 = scmp.ne.s32.totalorder %s2524_s25, %s2520_s24  ;;  %p46_p1 = scmp.eq.s32.totalorder %s2601_s28, 0 }
   0xb   : > { %p195_p2 = scmp.eq.s32.totalorder %s2601_s28, 2  ;;  %p201_p3 = scmp.eq.s32.totalorder %s1663_s29, 2 }
   0xc   : > { %p2610_p4 = por %p46_p1, %p45_p0  ;;  %p1664_p5 = scmp.ge.s32.totalorder %s2532_s27, 1 }
   0xd   : > { %p2615_p6 = por %p201_p3, %p45_p0  ;;  %p208_p7 = scmp.lt.s32.totalorder %s2532_s27, 4 }
   0xe   : > { %s2935_s1 = sld [smem:[#allocation16_spill]]  ;;  %s2534_s13 = smov [#allocation5]  }
   0xf   : > { %p2623_p8 = pnand %p1664_p5, %p208_p7  ;;  %s221_s14 = sshll.u32 %s2534_s13, 4  ;;  %s222_s14 = int_to_ptr.vmem [resolvable:$true] %s221_s14 }
  0x10   : > { %s245_s18 = sshll.u32 %s2925_s3, 4  ;;  %s2930_s19 = smov 128   ;;  %s246_s18 = int_to_ptr.hbm [resolvable:$true] %s245_s18 }
  0x11   : > { %p2231_p9 = pneg %p2623_p8  ;;  %s2931_s20 = smov 8  }
  0x12   : > { %s2537_s21 = smov [#allocation8]   ;;  %s234_s9 = sshll.u32 %s2924_s2, 4  ;;  %s235_s9 = int_to_ptr.hbm [resolvable:$true] %s234_s9 }
  0x13   : > { %p2631_p10 = pnand %p2231_p9, %p46_p1  ;;  %s247_s22 = sshll.u32 %s2537_s21, 4  ;;  %s248_s22 = int_to_ptr.vmem [resolvable:$true] %s247_s22 }
  0x14   : > { %s219_s11 = sshll.u32 %s2935_s1, 4  ;;  %s262_s13 = sshll.u32 %s2927_s5, 4  ;;  %s220_s11 = int_to_ptr.hbm [resolvable:$true] %s219_s11  ;;  %s263_s13 = int_to_ptr.hbm [resolvable:$true] %s262_s13 }
  0x15   : > { %2234 = dma.hbm_to_vmem [thread:$0]  (!%p2631_p10), %s220_s11, 4096, %s222_s14, [#allocation6], %s2930_s19, %s2930_s19, %s2931_s20  }
  0x16   : > { %2240 = dma.hbm_to_vmem [thread:$0]  (!%p2631_p10), %s246_s18, 4096, %s248_s22, [#allocation9], %s2930_s19, %s2930_s19, %s2931_s20  }
  0x17   : > { %s2538_s14 = smov [#allocation7]   ;;  %s2539_s17 = smov [#allocation10]  }
  0x18   : > { %s236_s16 = sshll.u32 %s2538_s14, 4  ;;  %s264_s21 = sshll.u32 %s2539_s17, 4  ;;  %s237_s16 = int_to_ptr.vmem [resolvable:$true] %s236_s16  ;;  %s265_s21 = int_to_ptr.vmem [resolvable:$true] %s264_s21 }
  0x19   : > { %2237 = dma.hbm_to_vmem [thread:$0]  (!%p2631_p10), %s235_s9, 32, %s237_s16, [#allocation6]  }
  0x1a   : > { %2243 = dma.hbm_to_vmem [thread:$0]  (!%p2631_p10), %s263_s13, 4096, %s265_s21, [#allocation9], %s2930_s19, %s2930_s19, %s2931_s20  }
  0x1b   : > { %s2662_s18 = sadd.s32 1, %s2532_s27   ;;  %s32_s22 = sadd.s32 1, %s2528_s26 }
  0x1c   : > { %s29_s23 = ssub.s32 %s2532_s27, %s2662_s18  ;;  %p39_p11 = scmp.ne.s32.totalorder %s2528_s26, %s2524_s25 }
  0x1d   : > { %p30_p12 = scmp.eq.s32.totalorder %s29_s23, 0  ;;  %p40_p13 = scmp.eq.s32.totalorder %s2532_s27, 0 }
  0x1e   : > { %p2672_p0 = por %p195_p2, %p39_p11  ;;  %p2256_p3 = scmp.lt.s32.totalorder %s2532_s27, 3 }
  0x1f   : > { %s2678_s9 = scalar_select %p30_p12, %s2528_s26, %s32_s22  }
  0x20   : > { %p41_p5 = por %p40_p13, %p39_p11  ;;  %s281_s15 = sand.u32 1, %s2528_s26  }
  0x21   : > { %s1670_s10 = sshll.u32 %s281_s15, 6  ;;  %s2105_s11 = sshll.u32 %s2532_s27, 6 }
  0x22   : > { %s291_s16 = scalar_lea.hbm %s2922_s0, %s2105_s11  ;;  %s285_s17 = scalar_lea.vmem [#allocation2], %s1670_s10 }
  0x23   : > { %s294_s21 = sshll.u32 %s285_s17, 4  ;;  %s292_s23 = sshll.u32 %s291_s16, 4  ;;  %s295_s21 = int_to_ptr.vmem [resolvable:$true] %s294_s21  ;;  %s293_s23 = int_to_ptr.hbm [resolvable:$true] %s292_s23 }
  0x24   : > { %p2685_p2 = pnand %p2256_p3, %p41_p5  ;;  %s282_s22 = scalar_lea.sflag [#allocation3], %s281_s15 }
  0x25   : > { %s2428_s20 = sshra.s32 %s293_s23, 4  ;;  %s2435_s13 = scalar_lea.hbm %s2922_s0, 192  ;;  %s2429_s20 = int_to_ptr.hbm [resolvable:$true] %s2428_s20 }
  0x26   : > { %s2430_s1 = scalar_lea.hbm %s2429_s20, 64  ;;  %p2432_p9 = pneg %p2685_p2 }
  0x27   : > { %p2431_p7 = scmp.ne.s32.totalorder %s2429_s20, %s2430_s1  ;;  %p2436_p12 = scmp.lt.s32.totalorder %s2429_s20, %s2922_s0 }
  0x28   : > { %p2437_p13 = scmp.lt.s32.totalorder %s2435_s13, %s2430_s1 }
  0x29   : > { %p2433_p10 = pnand %p2432_p9, %p2431_p7 }
  0x2a   : > { %p2438_p3 = por %p2437_p13, %p2436_p12 }
  0x2b   : > { %p2434_p11 = pneg %p2433_p10 }
  0x2d   : > { %p2439_p5 = pnand %p2438_p3, %p2434_p11 }
  0x2f   : > { %2442 = shalt.err (!%p2439_p5)
}
  0x30   : > { %s2940_s15 = smov 8   ;;  %s2941_s17 = smov 128  }
  0x31   : > { %2247 = dma.hbm_to_vmem [thread:$0]  (!%p2685_p2), %s293_s23, 1024, %s295_s21, %s282_s22, %s2941_s17, %s2941_s17, %s2940_s15  }
  0x32   : > { %306 = sbr.rel (%p2623_p8) target bundleno = 499 (0x1f3), region = 48  ;;  %s2705_s11 = sand.u32 (!%p2623_p8), 1, %s2524_s25  }
  0x33   : > { %s1675_s20 = sshll.u32 (!%p2623_p8), %s2705_s11, 6  ;;  %s309_s1 = scalar_lea.sflag (!%p2623_p8), [#allocation3], %s2705_s11 }
  0x34   : > { %s2709_s10 = scalar_lea.vmem (!%p2623_p8), [#allocation2], %s1675_s20 }
  0x37   : > { %2503 = dma.done.wait (%p2610_p4), %s309_s1, 1024  }
  0x38   : > { %2505 = vsyncadd (%p2610_p4), %s309_s1, 4294966272 }
  0x39   : > { %2507 = dma.done.wait (%p46_p1), [#allocation6], 4128  }
  0x3a   : > { %2509 = vsyncadd (%p46_p1), [#allocation6], 4294963168 }
  0x3b   : > { %2511 = dma.done.wait (%p46_p1), [#allocation9], 8192  }
  0x3c   : > { %2513 = vsyncadd (%p46_p1), [#allocation9], 4294959104  ;;  %v1771_v0 = vld [vmem:[#allocation5 + $0x70] sm:$0xf]  ;;  %v2121_v1 = vld [vmem:[#allocation5 + $0x74] sm:$0xf0] }
  0x3d   : > { %v1835_v2 = vld [vmem:[#allocation5 + $0xf0] sm:$0xf]  ;;  %v1772_v3 = vor.u32 %v2121_v1, %v1771_v0  ;;  %v2137_v4 = vld [vmem:[#allocation5 + $0xf4] sm:$0xf0]  ;;  %v2120_v5 = vld [vmem:[#allocation5 + $0x74] sm:$0xf] }
  0x3e   : > { %v1773_v6 = vld [vmem:[#allocation5 + $0x78] sm:$0xf0]  ;;  %v1836_v7 = vor.u32 %v2137_v4, %v1835_v2  ;;  %v2136_v9 = vld [vmem:[#allocation5 + $0xf4] sm:$0xf]  ;;  %v1763_v11 = vld [vmem:[#allocation5 + $0x60] sm:$0xf] }
  0x3f   : > { %v1776_v8 = vor.u32 %v2120_v5, %v1773_v6  ;;  %v1837_v10 = vld [vmem:[#allocation5 + $0xf8] sm:$0xf0]  ;;  %672 = vmatpush.bf16.msra.mxu0 %v1772_v3  ;;  %v2119_v13 = vld [vmem:[#allocation5 + $0x64] sm:$0xf0]  ;;  %v1827_v14 = vld [vmem:[#allocation5 + $0xe0] sm:$0xf] }
  0x40   : > { %v1840_v12 = vor.u32 %v2136_v9, %v1837_v10  ;;  %v2135_v15 = vld [vmem:[#allocation5 + $0xe4] sm:$0xf0]  ;;  %701 = vmatpush.bf16.msra.mxu1 %v1836_v7  ;;  %v1764_v16 = vor.u32 %v2119_v13, %v1763_v11  ;;  %v2118_v18 = vld [vmem:[#allocation5 + $0x64] sm:$0xf]  ;;  %v1765_v19 = vld [vmem:[#allocation5 + $0x68] sm:$0xf0] }
  0x41   : > { %730 = vmatpush.bf16.msra.mxu2 %v1776_v8  ;;  %v1828_v17 = vor.u32 %v2135_v15, %v1827_v14  ;;  %v2134_v20 = vld [vmem:[#allocation5 + $0xe4] sm:$0xf]  ;;  %v1768_v21 = vor.u32 %v2118_v18, %v1765_v19  ;;  %v1829_v22 = vld [vmem:[#allocation5 + $0xe8] sm:$0xf0]  ;;  %v1755_v23 = vld [vmem:[#allocation5 + $0x50] sm:$0xf] }
  0x42   : > { %759 = vmatpush.bf16.msra.mxu3 %v1840_v12  ;;  %v2117_v24 = vld [vmem:[#allocation5 + $0x54] sm:$0xf0]  ;;  %v1832_v25 = vor.u32 %v2134_v20, %v1829_v22  ;;  %v1819_v26 = vld [vmem:[#allocation5 + $0xd0] sm:$0xf]  ;;  %v2116_v28 = vld [vmem:[#allocation5 + $0x54] sm:$0xf] }
  0x43   : > { %v2133_v27 = vld [vmem:[#allocation5 + $0xd4] sm:$0xf0]  ;;  %673 = vmatpush.bf16.msra.mxu0 %v1764_v16  ;;  %v1756_v29 = vor.u32 %v2117_v24, %v1755_v23  ;;  %v1757_v30 = vld [vmem:[#allocation5 + $0x58] sm:$0xf0]  ;;  %v2132_v31 = vld [vmem:[#allocation5 + $0xd4] sm:$0xf] }
  0x44   : > { %v1821_v32 = vld [vmem:[#allocation5 + $0xd8] sm:$0xf0]  ;;  %702 = vmatpush.bf16.msra.mxu1 %v1828_v17  ;;  %v1820_v33 = vor.u32 %v2133_v27, %v1819_v26  ;;  %v1760_v34 = vor.u32 %v2116_v28, %v1757_v30  ;;  %v1747_v35 = vld [vmem:[#allocation5 + $0x40] sm:$0xf]  ;;  %v2115_v36 = vld [vmem:[#allocation5 + $0x44] sm:$0xf0] }
  0x45   : > { %731 = vmatpush.bf16.msra.mxu2 %v1768_v21  ;;  %v1811_v37 = vld [vmem:[#allocation5 + $0xc0] sm:$0xf]  ;;  %v1824_v38 = vor.u32 %v2132_v31, %v1821_v32  ;;  %v2131_v39 = vld [vmem:[#allocation5 + $0xc4] sm:$0xf0]  ;;  %v2114_v40 = vld [vmem:[#allocation5 + $0x44] sm:$0xf]  ;;  %v1748_v44 = vor.u32 %v2115_v36, %v1747_v35 }
  0x46   : > { %760 = vmatpush.bf16.msra.mxu3 %v1832_v25  ;;  %v1749_v41 = vld [vmem:[#allocation5 + $0x48] sm:$0xf0]  ;;  %v2130_v42 = vld [vmem:[#allocation5 + $0xc4] sm:$0xf]  ;;  %v1812_v45 = vor.u32 %v2131_v39, %v1811_v37  ;;  %v1739_v47 = vld [vmem:[#allocation5 + $0x30] sm:$0xf] }
  0x47   : > { %v1813_v43 = vld [vmem:[#allocation5 + $0xc8] sm:$0xf0]  ;;  %674 = vmatpush.bf16.msra.mxu0 %v1756_v29  ;;  %v1752_v46 = vor.u32 %v2114_v40, %v1749_v41  ;;  %v2113_v48 = vld [vmem:[#allocation5 + $0x34] sm:$0xf0]  ;;  %v1803_v49 = vld [vmem:[#allocation5 + $0xb0] sm:$0xf] }
  0x48   : > { %703 = vmatpush.bf16.msra.mxu1 %v1820_v33  ;;  %v1816_v50 = vor.u32 %v2130_v42, %v1813_v43  ;;  %v2129_v51 = vld [vmem:[#allocation5 + $0xb4] sm:$0xf0]  ;;  %v2112_v52 = vld [vmem:[#allocation5 + $0x34] sm:$0xf]  ;;  %v1741_v53 = vld [vmem:[#allocation5 + $0x38] sm:$0xf0]  ;;  %v1740_v56 = vor.u32 %v2113_v48, %v1739_v47 }
  0x49   : > { %732 = vmatpush.bf16.msra.mxu2 %v1760_v34  ;;  %v2128_v54 = vld [vmem:[#allocation5 + $0xb4] sm:$0xf]  ;;  %v1805_v55 = vld [vmem:[#allocation5 + $0xb8] sm:$0xf0]  ;;  %v1804_v57 = vor.u32 %v2129_v51, %v1803_v49  ;;  %v1744_v58 = vor.u32 %v2112_v52, %v1741_v53  ;;  %v1731_v59 = vld [vmem:[#allocation5 + $0x20] sm:$0xf] }
  0x4a   : > { %761 = vmatpush.bf16.msra.mxu3 %v1824_v38  ;;  %v2111_v60 = vld [vmem:[#allocation5 + $0x24] sm:$0xf0]  ;;  %v1795_v61 = vld [vmem:[#allocation5 + $0xa0] sm:$0xf]  ;;  %v1808_v62 = vor.u32 %v2128_v54, %v1805_v55  ;;  %v2110_v0 = vld [vmem:[#allocation5 + $0x24] sm:$0xf] }
  0x4b   : > { %675 = vmatpush.bf16.msra.mxu0 %v1748_v44  ;;  %v2127_v63 = vld [vmem:[#allocation5 + $0xa4] sm:$0xf0]  ;;  %v1733_v1 = vld [vmem:[#allocation5 + $0x28] sm:$0xf0]  ;;  %v2126_v2 = vld [vmem:[#allocation5 + $0xa4] sm:$0xf]  ;;  %v1732_v4 = vor.u32 %v2111_v60, %v1731_v59 }
  0x4c   : > { %704 = vmatpush.bf16.msra.mxu1 %v1812_v45  ;;  %v1797_v3 = vld [vmem:[#allocation5 + $0xa8] sm:$0xf0]  ;;  %v1796_v5 = vor.u32 %v2127_v63, %v1795_v61  ;;  %v1736_v6 = vor.u32 %v2110_v0, %v1733_v1  ;;  %v1723_v7 = vld [vmem:[#allocation5 + $0x10] sm:$0xf]  ;;  %v2109_v8 = vld [vmem:[#allocation5 + $0x14] sm:$0xf0] }
  0x4d   : > { %733 = vmatpush.bf16.msra.mxu2 %v1752_v46  ;;  %v1787_v9 = vld [vmem:[#allocation5 + $0x90] sm:$0xf]  ;;  %v1800_v10 = vor.u32 %v2126_v2, %v1797_v3  ;;  %v2125_v11 = vld [vmem:[#allocation5 + $0x94] sm:$0xf0]  ;;  %v2108_v12 = vld [vmem:[#allocation5 + $0x14] sm:$0xf]  ;;  %v1724_v16 = vor.u32 %v2109_v8, %v1723_v7 }
  0x4e   : > { %762 = vmatpush.bf16.msra.mxu3 %v1816_v50  ;;  %v1725_v13 = vld [vmem:[#allocation5 + $0x18] sm:$0xf0]  ;;  %v2124_v14 = vld [vmem:[#allocation5 + $0x94] sm:$0xf]  ;;  %v1788_v17 = vor.u32 %v2125_v11, %v1787_v9  ;;  %v1715_v19 = vld [vmem:[#allocation5] sm:$0xf] }
  0x4f   : > { %676 = vmatpush.bf16.msra.mxu0 %v1740_v56  ;;  %v1789_v15 = vld [vmem:[#allocation5 + $0x98] sm:$0xf0]  ;;  %v1728_v18 = vor.u32 %v2108_v12, %v1725_v13  ;;  %v2107_v20 = vld [vmem:[#allocation5 + $0x4] sm:$0xf0]  ;;  %v1779_v21 = vld [vmem:[#allocation5 + $0x80] sm:$0xf] }
  0x50   : > { %705 = vmatpush.bf16.msra.mxu1 %v1804_v57  ;;  %v1792_v22 = vor.u32 %v2124_v14, %v1789_v15  ;;  %v2123_v23 = vld [vmem:[#allocation5 + $0x84] sm:$0xf0]  ;;  %v2106_v24 = vld [vmem:[#allocation5 + $0x4] sm:$0xf]  ;;  %v1717_v25 = vld [vmem:[#allocation5 + $0x8] sm:$0xf0]  ;;  %v1716_v28 = vor.u32 %v2107_v20, %v1715_v19 }
  0x51   : > { %734 = vmatpush.bf16.msra.mxu2 %v1744_v58  ;;  %v2122_v26 = vld [vmem:[#allocation5 + $0x84] sm:$0xf]  ;;  %v1781_v27 = vld [vmem:[#allocation5 + $0x88] sm:$0xf0]  ;;  %v1683_v29 = vld [vmem:[%s2709_s10] sm:$0xf]  ;;  %v1780_v31 = vor.u32 %v2123_v23, %v1779_v21  ;;  %v1720_v32 = vor.u32 %v2106_v24, %v1717_v25 }
  0x52   : > { %763 = vmatpush.bf16.msra.mxu3 %v1808_v62  ;;  %v2203_v30 = vld [vmem:[%s2709_s10 + $0x4] sm:$0xf0]  ;;  %v2202_v33 = vld [vmem:[%s2709_s10 + $0x4] sm:$0xf]  ;;  %v1685_v34 = vld [vmem:[%s2709_s10 + $0x8] sm:$0xf0]  ;;  %v1784_v35 = vor.u32 %v2122_v26, %v1781_v27 }
  0x53   : > { %677 = vmatpush.bf16.msra.mxu0 %v1732_v4  ;;  %v1684_v36 = vor.u32 %v2203_v30, %v1683_v29  ;;  %v1688_v37 = vor.u32 %v2202_v33, %v1685_v34  ;;  %v1691_v38 = vld [vmem:[%s2709_s10 + $0x10] sm:$0xf]  ;;  %v2205_v39 = vld [vmem:[%s2709_s10 + $0x14] sm:$0xf0]  ;;  %v2204_v40 = vld [vmem:[%s2709_s10 + $0x14] sm:$0xf] }
  0x54   : > { %706 = vmatpush.bf16.msra.mxu1 %v1796_v5  ;;  %v1693_v41 = vld [vmem:[%s2709_s10 + $0x18] sm:$0xf0]  ;;  %v1692_v42 = vor.u32 %v2205_v39, %v1691_v38  ;;  %v1699_v44 = vld [vmem:[%s2709_s10 + $0x20] sm:$0xf]  ;;  %v2207_v45 = vld [vmem:[%s2709_s10 + $0x24] sm:$0xf0] }
  0x55   : > { %735 = vmatpush.bf16.msra.mxu2 %v1736_v6  ;;  %v1696_v43 = vor.u32 %v2204_v40, %v1693_v41  ;;  %v2206_v46 = vld [vmem:[%s2709_s10 + $0x24] sm:$0xf]  ;;  %v1701_v47 = vld [vmem:[%s2709_s10 + $0x28] sm:$0xf0]  ;;  %v1700_v48 = vor.u32 %v2207_v45, %v1699_v44  ;;  %v1707_v50 = vld [vmem:[%s2709_s10 + $0x30] sm:$0xf] }
  0x56   : > { %764 = vmatpush.bf16.msra.mxu3 %v1800_v10  ;;  %v1704_v49 = vor.u32 %v2206_v46, %v1701_v47  ;;  %v2209_v51 = vld [vmem:[%s2709_s10 + $0x34] sm:$0xf0]  ;;  %v2208_v52 = vld [vmem:[%s2709_s10 + $0x34] sm:$0xf]  ;;  %v1709_v53 = vld [vmem:[%s2709_s10 + $0x38] sm:$0xf0] }
  0x57   : > { %678 = vmatpush.bf16.msra.mxu0 %v1724_v16  ;;  %v1708_v54 = vor.u32 %v2209_v51, %v1707_v50  ;;  %v1712_v55 = vor.u32 %v2208_v52, %v1709_v53  ;;  %v2152_v62 = vld [vmem:[#allocation8 + $0x74] sm:$0xf]  ;;  %v1901_v63 = vld [vmem:[#allocation8 + $0x78] sm:$0xf0]  ;;  %v1899_v0 = vld [vmem:[#allocation8 + $0x70] sm:$0xf] }
  0x58   : > { %707 = vmatpush.bf16.msra.mxu1 %v1788_v17  ;;  %v1904_v4 = vor.u32 %v2152_v62, %v1901_v63  ;;  %v2153_v5 = vld [vmem:[#allocation8 + $0x74] sm:$0xf0]  ;;  %v2150_v12 = vld [vmem:[#allocation8 + $0x64] sm:$0xf]  ;;  %v1893_v13 = vld [vmem:[#allocation8 + $0x68] sm:$0xf0] }
  0x59   : > { %736 = vmatpush.bf16.msra.mxu2 %v1728_v18  ;;  %v1900_v8 = vor.u32 %v2153_v5, %v1899_v0  ;;  %v1896_v15 = vor.u32 %v2150_v12, %v1893_v13  ;;  %v1891_v16 = vld [vmem:[#allocation8 + $0x60] sm:$0xf]  ;;  %v2151_v17 = vld [vmem:[#allocation8 + $0x64] sm:$0xf0]  ;;  %v2168_v19 = vld [vmem:[#allocation8 + $0xf4] sm:$0xf] }
  0x5a   : > { %765 = vmatpush.bf16.msra.mxu3 %v1792_v22  ;;  %v1965_v20 = vld [vmem:[#allocation8 + $0xf8] sm:$0xf0]  ;;  %v1963_v21 = vld [vmem:[#allocation8 + $0xf0] sm:$0xf]  ;;  %v1892_v22 = vor.u32 %v2151_v17, %v1891_v16  ;;  %v2169_v26 = vld [vmem:[#allocation8 + $0xf4] sm:$0xf0] }
  0x5b   : > { %679 = vmatpush.bf16.msra.mxu0 %v1716_v28  ;;  %v461_v23 = vld [vmem:[#allocation7] sm:$0x3]  ;;  %v1968_v25 = vor.u32 %v2168_v19, %v1965_v20  ;;  %v1964_v30 = vor.u32 %v2169_v26, %v1963_v21  ;;  %v2149_v38 = vld [vmem:[#allocation8 + $0x54] sm:$0xf0]  ;;  %v1955_v44 = vld [vmem:[#allocation8 + $0xe0] sm:$0xf] }
  0x5c   : > { %708 = vmatpush.bf16.msra.mxu1 %v1780_v31  ;;  %v2148_v31 = vld [vmem:[#allocation8 + $0x54] sm:$0xf]  ;;  %v2739_v46 = vperm.slane %v461_v23, 0  ;;  %v2167_v50 = vld [vmem:[#allocation8 + $0xe4] sm:$0xf0]  ;;  %vm975_vm0 = vcmask 1041409  }
  0x5d   : > { %737 = vmatpush.bf16.msra.mxu2 %v1720_v32  ;;  %v1885_v32 = vld [vmem:[#allocation8 + $0x58] sm:$0xf0]  ;;  %v2164_v63 = vld [vmem:[#allocation8 + $0xd4] sm:$0xf]  ;;  %v1867_v12 = vld [vmem:[#allocation8 + $0x30] sm:$0xf] }
  0x5e   : > { %766 = vmatpush.bf16.msra.mxu3 %v1784_v35  ;;  %680 = vmatmul.bf16.vlgmr.msra.gmra.mxu0 %v1684_v36  ;;  %v1949_v0 = vld [vmem:[#allocation8 + $0xd8] sm:$0xf0]  ;;  %v2145_v13 = vld [vmem:[#allocation8 + $0x34] sm:$0xf0]  ;;  %v2144_v20 = vld [vmem:[#allocation8 + $0x34] sm:$0xf] }
  0x5f   : > { %709 = vmatmul.bf16.vlgmr.msra.gmra.mxu1 %v1688_v37  ;;  %1173 = vmatpush.bf16.msrb.mxu0 %v1900_v8  ;;  %v1868_v19 = vor.u32 %v2145_v13, %v1867_v12  ;;  %v1869_v21 = vld [vmem:[#allocation8 + $0x38] sm:$0xf0]  ;;  %v1941_v26 = vld [vmem:[#allocation8 + $0xc8] sm:$0xf0]  ;;  %vm978_vm1 = vcmask 1042434   ;;  %vm981_vm2 = vcmask 1043459  }
  0x60   : > { %738 = vmatmul.bf16.vlgmr.msra.gmra.mxu2 %v1684_v36  ;;  %v1888_v36 = vor.u32 %v2148_v31, %v1885_v32  ;;  %1186 = vmatpush.bf16.msrb.mxu1 %v1964_v30  ;;  %v1939_v32 = vld [vmem:[#allocation8 + $0xc0] sm:$0xf]  ;;  %vm984_vm3 = vcmask 1044484   ;;  %vm987_vm4 = vcmask 1045509   ;;  %vm990_vm5 = vcmask 1046534   ;;  %s1680_s23 = sshll.u32 %s2705_s11, 4 }
  0x61   : > { %767 = vmatmul.bf16.vlgmr.msra.gmra.mxu3 %v1688_v37  ;;  %1199 = vmatpush.bf16.msrb.mxu2 %v1904_v4  ;;  %v1883_v37 = vld [vmem:[#allocation8 + $0x50] sm:$0xf]  ;;  %vm993_vm6 = vcmask 1047559   ;;  %s2210_s22 = sshll.u32 %s2601_s28, 4  ;;  %s363_s28 = scalar_lea.vmem [#allocation11], %s1680_s23 }
  0x62   : > { %1212 = vmatpush.bf16.msrb.mxu3 %v1968_v25  ;;  %v1884_v45 = vor.u32 %v2149_v38, %v1883_v37  ;;  %v2162_v25 = vld [vmem:[#allocation8 + $0xc4] sm:$0xf]  ;;  %v1859_v37 = vld [vmem:[#allocation8 + $0x20] sm:$0xf]  ;;  %v2143_v38 = vld [vmem:[#allocation8 + $0x24] sm:$0xf0]  ;;  %s1550_s16 = scalar_lea.hbm %s2929_s7, %s2210_s22 }
  0x63   : > { %1174 = vmatpush.bf16.msrb.mxu0 %v1892_v22  ;;  %v1944_v31 = vor.u32 %v2162_v25, %v1941_v26  ;;  %v2140_v26 = vld [vmem:[#allocation8 + $0x14] sm:$0xf]  ;;  %s1552_s15 = sshll.u32 %s363_s28, 4  ;;  %s1554_s17 = sshll.u32 %s1550_s16, 4  ;;  %s1553_s15 = int_to_ptr.vmem [resolvable:$true] %s1552_s15  ;;  %s1555_s17 = int_to_ptr.hbm [resolvable:$true] %s1554_s17 }
  0x64   : > { %s1539_s20 = scalar_lea.sflag [#allocation4], %s2705_s11  ;;  %s2472_s1 = sshra.s32 %s1555_s17, 4  ;;  %s2473_s1 = int_to_ptr.hbm [resolvable:$true] %s2472_s1 }
  0x65   : > { %1200 = vmatpush.bf16.msrb.mxu2 %v1896_v15  ;;  %s2474_s10 = scalar_lea.hbm %s2473_s1, 16  ;;  %s2478_s19 = scalar_lea.hbm %s2929_s7, 48 }
  0x66   : > { %p2475_p1 = scmp.ne.s32.totalorder %s2473_s1, %s2474_s10  ;;  %p2479_p2 = scmp.lt.s32.totalorder %s2473_s1, %s2929_s7 }
  0x67   : > { %1175 = vmatpush.bf16.msrb.mxu0 %v1884_v45  ;;  %p2480_p7 = scmp.lt.s32.totalorder %s2478_s19, %s2474_s10 }
  0x68   : > { %p2476_p4 = pnand %p2475_p1, %p2672_p0 }
  0x69   : > { %1201 = vmatpush.bf16.msrb.mxu2 %v1888_v36  ;;  %p2481_p9 = por %p2480_p7, %p2479_p2 }
  0x6a   : > { %p2477_p8 = pneg %p2476_p4 }
  0x6c   : > { %p2482_p10 = pnand %p2481_p9, %p2477_p8 }
  0x6e   : > { %685 = vmatmul.bf16.gmra.mxu0 %v1692_v42 }
  0x6f   : > { %714 = vmatmul.bf16.gmra.mxu1 %v1696_v43 }
  0x70   : > { %743 = vmatmul.bf16.gmra.mxu2 %v1692_v42  ;;  %v2166_v42 = vld [vmem:[#allocation8 + $0xe4] sm:$0xf] }
  0x71   : > { %772 = vmatmul.bf16.gmra.mxu3 %v1696_v43  ;;  %v1957_v43 = vld [vmem:[#allocation8 + $0xe8] sm:$0xf0] }
  0x7e   : > { %690 = vmatmul.bf16.gmra.mxu0 %v1700_v48 }
  0x7f   : > { %719 = vmatmul.bf16.gmra.mxu1 %v1704_v49 }
  0x80   : > { %748 = vmatmul.bf16.gmra.mxu2 %v1700_v48 }
  0x81   : > { %777 = vmatmul.bf16.gmra.mxu3 %v1704_v49  ;;  %v1960_v49 = vor.u32 %v2166_v42, %v1957_v43  ;;  %v2142_v43 = vld [vmem:[#allocation8 + $0x24] sm:$0xf] }
  0x83   : > { %1213 = vmatpush.bf16.msrb.mxu3 %v1960_v49  ;;  %v1860_v49 = vor.u32 %v2143_v38, %v1859_v37 }
  0x8e   : > { %695 = vmatmul.bf16.gmra.mxu0 %v1708_v54 }
  0x8f   : > { %724 = vmatmul.bf16.gmra.mxu1 %v1712_v55 }
  0x90   : > { %753 = vmatmul.bf16.gmra.mxu2 %v1708_v54  ;;  %v1956_v54 = vor.u32 %v2167_v50, %v1955_v44  ;;  %v1861_v50 = vld [vmem:[#allocation8 + $0x28] sm:$0xf0] }
  0x91   : > { %782 = vmatmul.bf16.gmra.mxu3 %v1712_v55  ;;  %v2146_v55 = vld [vmem:[#allocation8 + $0x44] sm:$0xf] }
  0x92   : > { %1187 = vmatpush.bf16.msrb.mxu1 %v1956_v54 }
  0xdb   : > { %v681_v56 = vpop.f32.mrf.mxu0 }
  0xdc   : > { %v710_v57 = vpop.f32.mrf.mxu1 }
  0xdd   : > { %v711_v58 = vadd.f32 %v710_v57, %v681_v56  ;;  %v1877_v56 = vld [vmem:[#allocation8 + $0x48] sm:$0xf0] }
  0xdf   : > { %v788_v59 = vrot.slane %v711_v58, 4 }
  0xe1   : > { %v789_v60 = vmax.f32 %v711_v58, %v788_v59  ;;  %v1880_v59 = vor.u32 %v2146_v55, %v1877_v56  ;;  %v1931_v55 = vld [vmem:[#allocation8 + $0xb0] sm:$0xf]  ;;  %v2161_v56 = vld [vmem:[#allocation8 + $0xb4] sm:$0xf0] }
  0xe3   : > { %v739_v61 = vpop.f32.mrf.mxu2  ;;  %v790_v1 = vrot.slane %v789_v60, 2  ;;  %v683_v3 = vpop.f32.mrf.mxu0  ;;  %1202 = vmatpush.bf16.msrb.mxu2 %v1880_v59 }
  0xe4   : > { %v768_v2 = vpop.f32.mrf.mxu3  ;;  %v712_v7 = vpop.f32.mrf.mxu1 }
  0xe5   : > { %v769_v6 = vadd.f32 %v768_v2, %v739_v61  ;;  %v713_v9 = vadd.f32 %v712_v7, %v683_v3  ;;  %v791_v10 = vmax.f32 %v789_v60, %v790_v1  ;;  %v1875_v60 = vld [vmem:[#allocation8 + $0x40] sm:$0xf]  ;;  %v2147_v61 = vld [vmem:[#allocation8 + $0x44] sm:$0xf0]  ;;  %v1947_v1 = vld [vmem:[#allocation8 + $0xd0] sm:$0xf] }
  0xe6   : > { %v1876_v2 = vor.u32 %v2147_v61, %v1875_v60  ;;  %v2741_v3 = vperm.slane %v461_v23, 1 }
  0xe7   : > { %v794_v11 = vrot.slane %v769_v6, 4  ;;  %v800_v14 = vrot.slane %v713_v9, 4  ;;  %v792_v27 = vrot.slane %v791_v10, 1 }
  0xe8   : > { %1176 = vmatpush.bf16.msrb.mxu0 %v1876_v2  ;;  %v1864_v2 = vor.u32 %v2142_v43, %v1861_v50 }
  0xe9   : > { %v795_v18 = vmax.f32 %v769_v6, %v794_v11  ;;  %v801_v24 = vmax.f32 %v713_v9, %v800_v14  ;;  %v793_v51 = vmax.f32 %v791_v10, %v792_v27  ;;  %v2165_v6 = vld [vmem:[#allocation8 + $0xd4] sm:$0xf0]  ;;  %v1952_v10 = vor.u32 %v2164_v63, %v1949_v0 }
  0xea   : > { %v1948_v11 = vor.u32 %v2165_v6, %v1947_v1  ;;  %v1872_v27 = vor.u32 %v2144_v20, %v1869_v21 }
  0xeb   : > { %v796_v28 = vrot.slane %v795_v18, 2  ;;  %v741_v29 = vpop.f32.mrf.mxu2  ;;  %v802_v33 = vrot.slane %v801_v24, 2  ;;  %v686_v35 = vpop.f32.mrf.mxu0  ;;  %v889_v7 = vadd.f32 %v2739_v46, %v793_v51  ;;  %1214 = vmatpush.bf16.msrb.mxu3 %v1952_v10 }
  0xec   : > { %v770_v34 = vpop.f32.mrf.mxu3  ;;  %v715_v41 = vpop.f32.mrf.mxu1  ;;  %1188 = vmatpush.bf16.msrb.mxu1 %v1948_v11  ;;  %1177 = vmatpush.bf16.msrb.mxu0 %v1868_v19 }
  0xed   : > { %v797_v39 = vmax.f32 %v795_v18, %v796_v28  ;;  %v771_v40 = vadd.f32 %v770_v34, %v741_v29  ;;  %v803_v47 = vmax.f32 %v801_v24, %v802_v33  ;;  %v716_v48 = vadd.f32 %v715_v41, %v686_v35  ;;  %v2163_v33 = vld [vmem:[#allocation8 + $0xc4] sm:$0xf0]  ;;  %1203 = vmatpush.bf16.msrb.mxu2 %v1872_v27  ;;  %v1853_v27 = vld [vmem:[#allocation8 + $0x18] sm:$0xf0] }
  0xee   : > { %v1940_v36 = vor.u32 %v2163_v33, %v1939_v32 }
  0xef   : > { %v798_v52 = vrot.slane %v797_v39, 1  ;;  %v806_v53 = vrot.slane %v771_v40, 4  ;;  %v804_v57 = vrot.slane %v803_v47, 1  ;;  %v812_v58 = vrot.slane %v716_v48, 4  ;;  %1215 = vmatpush.bf16.msrb.mxu3 %v1944_v31 }
  0xf0   : > { %1189 = vmatpush.bf16.msrb.mxu1 %v1940_v36  ;;  %1178 = vmatpush.bf16.msrb.mxu0 %v1860_v49 }
  0xf1   : > { %v807_v62 = vmax.f32 %v771_v40, %v806_v53  ;;  %v805_v4 = vmax.f32 %v803_v47, %v804_v57  ;;  %v813_v5 = vmax.f32 %v716_v48, %v812_v58  ;;  %v799_v14 = vmax.f32 %v797_v39, %v798_v52  ;;  %v2160_v47 = vld [vmem:[#allocation8 + $0xb4] sm:$0xf]  ;;  %v1933_v48 = vld [vmem:[#allocation8 + $0xb8] sm:$0xf0]  ;;  %1204 = vmatpush.bf16.msrb.mxu2 %v1864_v2 }
  0xf2   : > { %v2745_v39 = vmax.f32 %v889_v7, 0.0  ;;  %v1936_v61 = vor.u32 %v2160_v47, %v1933_v48 }
  0xf3   : > { %v808_v8 = vrot.slane %v807_v62, 2  ;;  %v744_v9 = vpop.f32.mrf.mxu2  ;;  %v891_v15 = vadd.f32 %v2739_v46, %v805_v4  ;;  %v814_v16 = vrot.slane %v813_v5, 2  ;;  %v688_v18 = vpop.f32.mrf.mxu0  ;;  %v890_v51 = vadd.f32 %v2741_v3, %v799_v14 }
  0xf4   : > { %v773_v17 = vpop.f32.mrf.mxu3  ;;  %v717_v24 = vpop.f32.mrf.mxu1  ;;  %1216 = vmatpush.bf16.msrb.mxu3 %v1936_v61 }
  0xf5   : > { %v809_v22 = vmax.f32 %v807_v62, %v808_v8  ;;  %v774_v23 = vadd.f32 %v773_v17, %v744_v9  ;;  %v907_v28 = vmax.f32 %v891_v15, 0.0  ;;  %v815_v29 = vmax.f32 %v813_v5, %v814_v16  ;;  %v1851_v17 = vld [vmem:[#allocation8 + $0x10] sm:$0xf] }
  0xf6   : > { %v718_v30 = vadd.f32 %v717_v24, %v688_v18  ;;  %v1932_v8 = vor.u32 %v2161_v56, %v1931_v55  ;;  %v906_v9 = vmax.f32 %v890_v51, 0.0  ;;  %v921_v18 = vpack.c.bf16 %v2745_v39, %v2745_v39 }
  0xf7   : > { %v810_v34 = vrot.slane %v809_v22, 1  ;;  %v818_v35 = vrot.slane %v774_v23, 4  ;;  %v1502_v40 = vrot.slane %v907_v28, 7  ;;  %v816_v41 = vrot.slane %v815_v29, 1 }
  0xf8   : > { %v824_v42 = vrot.slane %v718_v30, 4  ;;  %v923_v57 = vpack.c.bf16 %v907_v28, %v907_v28  ;;  %1190 = vmatpush.bf16.msrb.mxu1 %v1932_v8  ;;  %v922_v28 = vpack.c.bf16 %v906_v9, %v906_v9  ;;  %v958_v37 = vunpack.c.l.b16 %v921_v18 }
  0xf9   : > { %v811_v44 = vmax.f32 %v809_v22, %v810_v34  ;;  %v819_v45 = vmax.f32 %v774_v23, %v818_v35  ;;  %v1503_v52 = vsel %vm975_vm0, %v1502_v40, %v2745_v39  ;;  %v817_v53 = vmax.f32 %v815_v29, %v816_v41  ;;  %v2141_v22 = vld [vmem:[#allocation8 + $0x14] sm:$0xf0] }
  0xfa   : > { %v825_v54 = vmax.f32 %v718_v30, %v824_v42  ;;  %v960_v13 = vunpack.c.l.b16 %v923_v57  ;;  %v1852_v36 = vor.u32 %v2141_v22, %v1851_v17  ;;  %v1856_v42 = vor.u32 %v2140_v26, %v1853_v27  ;;  %v1923_v57 = vld [vmem:[#allocation8 + $0xa0] sm:$0xf] }
  0xfb   : > { %v892_v58 = vadd.f32 %v2741_v3, %v811_v44  ;;  %v820_v59 = vrot.slane %v819_v45, 2  ;;  %v746_v60 = vpop.f32.mrf.mxu2  ;;  %v893_v62 = vadd.f32 %v2739_v46, %v817_v53  ;;  %v691_v1 = vpop.f32.mrf.mxu0  ;;  %v2761_v49 = vunpack.c.l.b16 %v922_v28 }
  0xfc   : > { %v826_v63 = vrot.slane %v825_v54, 2  ;;  %v775_v0 = vpop.f32.mrf.mxu3  ;;  %v720_v7 = vpop.f32.mrf.mxu1  ;;  %v974_v32 = vrot.slane %v960_v13, 7  ;;  %1179 = vmatpush.bf16.msrb.mxu0 %v1852_v36  ;;  %1205 = vmatpush.bf16.msrb.mxu2 %v1856_v42 }
  0xfd   : > { %v2752_v4 = vmax.f32 %v892_v58, 0.0  ;;  %v821_v5 = vmax.f32 %v819_v45, %v820_v59  ;;  %v776_v6 = vadd.f32 %v775_v0, %v746_v60  ;;  %v909_v10 = vmax.f32 %v893_v62, 0.0  ;;  %v2159_v62 = vld [vmem:[#allocation8 + $0xa4] sm:$0xf0] }
  0xfe   : > { %v827_v11 = vmax.f32 %v825_v54, %v826_v63  ;;  %v721_v12 = vadd.f32 %v720_v7, %v691_v1  ;;  %v976_v53 = vsel %vm975_vm0, %v974_v32, %v958_v37 }
  0xff   : > { %v1516_v14 = vrot.slane %v2752_v4, 7  ;;  %v822_v15 = vrot.slane %v821_v5, 1  ;;  %v830_v16 = vrot.slane %v776_v6, 4  ;;  %v1504_v19 = vrot.slane %v909_v10, 6 }
 0x100   : > { %v828_v20 = vrot.slane %v827_v11, 1  ;;  %v836_v21 = vrot.slane %v721_v12, 4  ;;  %v925_v43 = vpack.c.bf16 %v909_v10, %v909_v10  ;;  %v924_v58 = vpack.c.bf16 %v2752_v4, %v2752_v4 }
 0x101   : > { %v1517_v23 = vsel %vm975_vm0, %v1516_v14, %v906_v9  ;;  %v823_v24 = vmax.f32 %v821_v5, %v822_v15  ;;  %v831_v25 = vmax.f32 %v776_v6, %v830_v16  ;;  %v1505_v29 = vsel %vm978_vm1, %v1504_v19, %v1503_v52  ;;  %v2158_v5 = vld [vmem:[#allocation8 + $0xa4] sm:$0xf]  ;;  %v1925_v6 = vld [vmem:[#allocation8 + $0xa8] sm:$0xf0] }
 0x102   : > { %v829_v30 = vmax.f32 %v827_v11, %v828_v20  ;;  %v837_v31 = vmax.f32 %v721_v12, %v836_v21  ;;  %v962_v63 = vunpack.c.l.b16 %v925_v43  ;;  %v1924_v14 = vor.u32 %v2159_v62, %v1923_v57 }
 0x103   : > { %v894_v33 = vadd.f32 %v2741_v3, %v823_v24  ;;  %v832_v34 = vrot.slane %v831_v25, 2  ;;  %v749_v35 = vpop.f32.mrf.mxu2  ;;  %v693_v41 = vpop.f32.mrf.mxu0  ;;  %v2769_v15 = vunpack.c.l.b16 %v924_v58  ;;  %v1928_v20 = vor.u32 %v2158_v5, %v1925_v6  ;;  %v2027_v58 = vld [vmem:[#allocation10 + $0x70] sm:$0xf] }
 0x104   : > { %v895_v38 = vadd.f32 %v2739_v46, %v829_v30  ;;  %v838_v39 = vrot.slane %v837_v31, 2  ;;  %v778_v40 = vpop.f32.mrf.mxu3  ;;  %v722_v48 = vpop.f32.mrf.mxu1  ;;  %v977_v21 = vrot.slane %v962_v63, 6  ;;  %1191 = vmatpush.bf16.msrb.mxu1 %v1924_v14 }
 0x105   : > { %v910_v44 = vmax.f32 %v894_v33, 0.0  ;;  %v833_v45 = vmax.f32 %v831_v25, %v832_v34  ;;  %v779_v47 = vadd.f32 %v778_v40, %v749_v35  ;;  %v723_v52 = vadd.f32 %v722_v48, %v693_v41  ;;  %1217 = vmatpush.bf16.msrb.mxu3 %v1928_v20  ;;  %v1843_v34 = vld [vmem:[#allocation8] sm:$0xf] }
 0x106   : > { %v911_v50 = vmax.f32 %v895_v38, 0.0  ;;  %v839_v51 = vmax.f32 %v837_v31, %v838_v39  ;;  %v995_v35 = vrot.slane %v2769_v15, 7  ;;  %v2139_v39 = vld [vmem:[#allocation8 + $0x4] sm:$0xf0]  ;;  %v979_v40 = vsel %vm978_vm1, %v977_v21, %v976_v53  ;;  %v2185_v53 = vld [vmem:[#allocation10 + $0x74] sm:$0xf0] }
 0x107   : > { %v1518_v54 = vrot.slane %v910_v44, 6  ;;  %v834_v55 = vrot.slane %v833_v45, 1  ;;  %v842_v56 = vrot.slane %v779_v47, 4  ;;  %v848_v61 = vrot.slane %v723_v52, 4  ;;  %v2029_v21 = vld [vmem:[#allocation10 + $0x78] sm:$0xf0] }
 0x108   : > { %v1506_v59 = vrot.slane %v911_v50, 5  ;;  %v840_v60 = vrot.slane %v839_v51, 1  ;;  %v926_v7 = vpack.c.bf16 %v910_v44, %v910_v44  ;;  %v927_v11 = vpack.c.bf16 %v911_v50, %v911_v50  ;;  %v2138_v44 = vld [vmem:[#allocation8 + $0x4] sm:$0xf]  ;;  %v2061_v15 = vld [vmem:[#allocation10 + $0xb8] sm:$0xf0] }
 0x109   : > { %v1519_v0 = vsel %vm978_vm1, %v1518_v54, %v1517_v23  ;;  %v835_v1 = vmax.f32 %v833_v45, %v834_v55  ;;  %v843_v2 = vmax.f32 %v779_v47, %v842_v56  ;;  %v849_v10 = vmax.f32 %v723_v52, %v848_v61  ;;  %v1845_v45 = vld [vmem:[#allocation8 + $0x8] sm:$0xf0] }
 0x10a   : > { %v1507_v8 = vsel %vm981_vm2, %v1506_v59, %v1505_v29  ;;  %v841_v9 = vmax.f32 %v839_v51, %v840_v60  ;;  %v2774_v26 = vunpack.c.l.b16 %v926_v7  ;;  %v964_v30 = vunpack.c.l.b16 %v927_v11 }
 0x10b   : > { %v896_v12 = vadd.f32 %v2741_v3, %v835_v1  ;;  %v844_v4 = vrot.slane %v843_v2, 2  ;;  %v751_v13 = vpop.f32.mrf.mxu2  ;;  %v850_v17 = vrot.slane %v849_v10, 2  ;;  %v696_v19 = vpop.f32.mrf.mxu0  ;;  %v1844_v57 = vor.u32 %v2139_v39, %v1843_v34  ;;  %v1917_v34 = vld [vmem:[#allocation8 + $0x98] sm:$0xf0] }
 0x10c   : > { %v897_v16 = vadd.f32 %v2739_v46, %v841_v9  ;;  %v780_v18 = vpop.f32.mrf.mxu3  ;;  %v725_v25 = vpop.f32.mrf.mxu1  ;;  %v997_v47 = vrot.slane %v2774_v26, 6  ;;  %v980_v52 = vrot.slane %v964_v30, 5  ;;  %v2028_v11 = vor.u32 %v2185_v53, %v2027_v58  ;;  %v2051_v26 = vld [vmem:[#allocation10 + $0xa0] sm:$0xf] }
 0x10d   : > { %v2772_v22 = vmax.f32 %v896_v12, 0.0  ;;  %v845_v23 = vmax.f32 %v843_v2, %v844_v4  ;;  %v781_v24 = vadd.f32 %v780_v18, %v751_v13  ;;  %v851_v28 = vmax.f32 %v849_v10, %v850_v17  ;;  %1180 = vmatpush.bf16.msrb.mxu0 %v1844_v57 }
 0x10e   : > { %v2776_v27 = vmax.f32 %v897_v16, 0.0  ;;  %v726_v29 = vadd.f32 %v725_v25, %v696_v19  ;;  %v2794_v12 = vsel %vm981_vm2, %v980_v52, %v979_v40  ;;  %v2184_v16 = vld [vmem:[#allocation10 + $0x74] sm:$0xf] }
 0x10f   : > { %v1520_v31 = vrot.slane %v2772_v22, 5  ;;  %v846_v32 = vrot.slane %v845_v23, 1  ;;  %v854_v33 = vrot.slane %v781_v24, 4  ;;  %v852_v37 = vrot.slane %v851_v28, 1 }
 0x110   : > { %v1508_v36 = vrot.slane %v2776_v27, 4  ;;  %v860_v38 = vrot.slane %v726_v29, 4  ;;  %v928_v59 = vpack.c.bf16 %v2772_v22, %v2772_v22  ;;  %v929_v1 = vpack.c.bf16 %v2776_v27, %v2776_v27  ;;  %v1915_v27 = vld [vmem:[#allocation8 + $0x90] sm:$0xf] }
 0x111   : > { %v1521_v41 = vsel %vm981_vm2, %v1520_v31, %v1519_v0  ;;  %v847_v42 = vmax.f32 %v845_v23, %v846_v32  ;;  %v855_v43 = vmax.f32 %v781_v24, %v854_v33  ;;  %v853_v50 = vmax.f32 %v851_v28, %v852_v37  ;;  %1392 = vmatpush.bf16.msra.mxu0 %v2028_v11  ;;  %v2157_v28 = vld [vmem:[#allocation8 + $0x94] sm:$0xf0]  ;;  %v2183_v37 = vld [vmem:[#allocation10 + $0x64] sm:$0xf0]  ;;  %v2011_v11 = vld [vmem:[#allocation10 + $0x50] sm:$0xf] }
 0x112   : > { %v1509_v48 = vsel %vm984_vm3, %v1508_v36, %v1507_v8  ;;  %v861_v51 = vmax.f32 %v726_v29, %v860_v38  ;;  %v1848_v0 = vor.u32 %v2138_v44, %v1845_v45  ;;  %v2797_v22 = vunpack.c.l.b16 %v928_v59  ;;  %v2156_v29 = vld [vmem:[#allocation8 + $0x94] sm:$0xf]  ;;  %v2019_v36 = vld [vmem:[#allocation10 + $0x60] sm:$0xf]  ;;  %v2021_v44 = vld [vmem:[#allocation10 + $0x68] sm:$0xf0] }
 0x113   : > { %v898_v54 = vadd.f32 %v2741_v3, %v847_v42  ;;  %v856_v55 = vrot.slane %v855_v43, 2  ;;  %v754_v56 = vpop.f32.mrf.mxu2  ;;  %v899_v60 = vadd.f32 %v2739_v46, %v853_v50  ;;  %v698_v63 = vpop.f32.mrf.mxu0  ;;  %v2800_v30 = vunpack.c.l.b16 %v929_v1  ;;  %v2154_v59 = vld [vmem:[#allocation8 + $0x84] sm:$0xf] }
 0x114   : > { %v862_v61 = vrot.slane %v861_v51, 2  ;;  %v783_v62 = vpop.f32.mrf.mxu3  ;;  %v727_v7 = vpop.f32.mrf.mxu1  ;;  %1206 = vmatpush.bf16.msrb.mxu2 %v1848_v0  ;;  %v2032_v42 = vor.u32 %v2184_v16, %v2029_v21  ;;  %v1916_v52 = vor.u32 %v2157_v28, %v1915_v27  ;;  %v1920_v53 = vor.u32 %v2156_v29, %v1917_v34  ;;  %v2199_v28 = vld [vmem:[#allocation10 + $0xe4] sm:$0xf0]  ;;  %v2198_v29 = vld [vmem:[#allocation10 + $0xe4] sm:$0xf] }
 0x115   : > { %v2791_v2 = vmax.f32 %v898_v54, 0.0  ;;  %v857_v5 = vmax.f32 %v855_v43, %v856_v55  ;;  %v784_v6 = vadd.f32 %v783_v62, %v754_v56  ;;  %v915_v8 = vmax.f32 %v899_v60, 0.0  ;;  %v2182_v43 = vld [vmem:[#allocation10 + $0x64] sm:$0xf]  ;;  %v1907_v54 = vld [vmem:[#allocation8 + $0x80] sm:$0xf] }
 0x116   : > { %v863_v9 = vmax.f32 %v861_v51, %v862_v61  ;;  %v728_v10 = vadd.f32 %v727_v7, %v698_v63  ;;  %v2155_v55 = vld [vmem:[#allocation8 + $0x84] sm:$0xf0]  ;;  %v1909_v60 = vld [vmem:[#allocation8 + $0x88] sm:$0xf0]  ;;  %v2091_v61 = vld [vmem:[#allocation10 + $0xf0] sm:$0xf]  ;;  %1192 = vmatpush.bf16.msrb.mxu1 %v1916_v52  ;;  %v2020_v1 = vor.u32 %v2183_v37, %v2019_v36  ;;  %1218 = vmatpush.bf16.msrb.mxu3 %v1920_v53 }
 0x117   : > { %v1522_v4 = vrot.slane %v2791_v2, 4  ;;  %v858_v13 = vrot.slane %v857_v5, 1  ;;  %v866_v14 = vrot.slane %v784_v6, 4  ;;  %v931_v17 = vpack.c.bf16 %v915_v8, %v915_v8  ;;  %v2201_v62 = vld [vmem:[#allocation10 + $0xf4] sm:$0xf0] }
 0x118   : > { %v1510_v18 = vrot.slane %v915_v8, 3  ;;  %v864_v19 = vrot.slane %v863_v9, 1  ;;  %v872_v20 = vrot.slane %v728_v10, 4  ;;  %v930_v38 = vpack.c.bf16 %v2791_v2, %v2791_v2  ;;  %1418 = vmatpush.bf16.msra.mxu2 %v2032_v42  ;;  %1393 = vmatpush.bf16.msra.mxu0 %v2020_v1  ;;  %v2197_v53 = vld [vmem:[#allocation10 + $0xd4] sm:$0xf0] }
 0x119   : > { %v1523_v23 = vsel %vm984_vm3, %v1522_v4, %v1521_v41  ;;  %v859_v24 = vmax.f32 %v857_v5, %v858_v13  ;;  %v867_v25 = vmax.f32 %v784_v6, %v866_v14  ;;  %v2808_v45 = vunpack.c.l.b16 %v931_v17  ;;  %v2200_v5 = vld [vmem:[#allocation10 + $0xf4] sm:$0xf]  ;;  %v2093_v6 = vld [vmem:[#allocation10 + $0xf8] sm:$0xf0]  ;;  %v2181_v4 = vld [vmem:[#allocation10 + $0x54] sm:$0xf0] }
 0x11a   : > { %v2803_v31 = vsel %vm987_vm4, %v1510_v18, %v1509_v48  ;;  %v865_v32 = vmax.f32 %v863_v9, %v864_v19  ;;  %v873_v33 = vmax.f32 %v728_v10, %v872_v20  ;;  %v2024_v2 = vor.u32 %v2182_v43, %v2021_v44  ;;  %v2180_v13 = vld [vmem:[#allocation10 + $0x54] sm:$0xf]  ;;  %v2013_v19 = vld [vmem:[#allocation10 + $0x58] sm:$0xf0]  ;;  %v2083_v20 = vld [vmem:[#allocation10 + $0xe0] sm:$0xf] }
 0x11b   : > { %v900_v39 = vadd.f32 %v2741_v3, %v859_v24  ;;  %v868_v40 = vrot.slane %v867_v25, 2  ;;  %v756_v41 = vpop.f32.mrf.mxu2  ;;  %v999_v7 = vrot.slane %v2797_v22, 5  ;;  %v983_v14 = vrot.slane %v2800_v30, 4  ;;  %v2178_v43 = vld [vmem:[#allocation10 + $0x44] sm:$0xf] }
 0x11c   : > { %v901_v48 = vadd.f32 %v2739_v46, %v865_v32  ;;  %v874_v50 = vrot.slane %v873_v33, 2  ;;  %v785_v51 = vpop.f32.mrf.mxu3  ;;  %v1908_v18 = vor.u32 %v2155_v55, %v1907_v54  ;;  %v2820_v21 = vunpack.c.l.b16 %v930_v38  ;;  %1419 = vmatpush.bf16.msra.mxu2 %v2024_v2  ;;  %v2085_v32 = vld [vmem:[#allocation10 + $0xe8] sm:$0xf0]  ;;  %v2175_v30 = vld [vmem:[#allocation10 + $0x24] sm:$0xf0] }
 0x11d   : > { %v2811_v56 = vmax.f32 %v900_v39, 0.0  ;;  %v869_v57 = vmax.f32 %v867_v25, %v868_v40  ;;  %v786_v58 = vadd.f32 %v785_v51, %v756_v41  ;;  %v1912_v36 = vor.u32 %v2154_v59, %v1909_v60  ;;  %v2003_v39 = vld [vmem:[#allocation10 + $0x40] sm:$0xf]  ;;  %v2179_v40 = vld [vmem:[#allocation10 + $0x44] sm:$0xf0] }
 0x11e   : > { %v2813_v63 = vmax.f32 %v901_v48, 0.0  ;;  %v875_v0 = vmax.f32 %v873_v33, %v874_v50  ;;  %v986_v33 = vrot.slane %v2808_v45, 3  ;;  %1193 = vmatpush.bf16.msrb.mxu1 %v1908_v18  ;;  %v2092_v37 = vor.u32 %v2201_v62, %v2091_v61  ;;  %v2005_v44 = vld [vmem:[#allocation10 + $0x48] sm:$0xf0] }
 0x11f   : > { %v1524_v8 = vrot.slane %v2811_v56, 3  ;;  %v870_v9 = vrot.slane %v869_v57, 1  ;;  %v878_v10 = vrot.slane %v786_v58, 4  ;;  %v932_v38 = vpack.c.bf16 %v2811_v56, %v2811_v56  ;;  %1219 = vmatpush.bf16.msrb.mxu3 %v1912_v36  ;;  %v2075_v56 = vld [vmem:[#allocation10 + $0xd0] sm:$0xf] }
 0x120   : > { %v933_v16 = vpack.c.bf16 %v2813_v63, %v2813_v63  ;;  %v876_v17 = vrot.slane %v875_v0, 1  ;;  %v2096_v42 = vor.u32 %v2200_v5, %v2093_v6  ;;  %v2012_v51 = vor.u32 %v2181_v4, %v2011_v11  ;;  %v2053_v22 = vld [vmem:[#allocation10 + $0xa8] sm:$0xf0] }
 0x121   : > { %v2823_v24 = vsel %vm987_vm4, %v1524_v8, %v1523_v23  ;;  %v871_v25 = vmax.f32 %v869_v57, %v870_v9  ;;  %v879_v27 = vmax.f32 %v786_v58, %v878_v10  ;;  %v2016_v52 = vor.u32 %v2180_v13, %v2013_v19  ;;  %v1995_v8 = vld [vmem:[#allocation10 + $0x30] sm:$0xf]  ;;  %v2177_v9 = vld [vmem:[#allocation10 + $0x34] sm:$0xf0]  ;;  %v1997_v13 = vld [vmem:[#allocation10 + $0x38] sm:$0xf0] }
 0x122   : > { %v877_v34 = vmax.f32 %v875_v0, %v876_v17  ;;  %v2829_v48 = vunpack.c.l.b16 %v933_v16  ;;  %1405 = vmatpush.bf16.msra.mxu1 %v2092_v37  ;;  %v2084_v57 = vor.u32 %v2199_v28, %v2083_v20  ;;  %v2088_v58 = vor.u32 %v2198_v29, %v2085_v32  ;;  %1394 = vmatpush.bf16.msra.mxu0 %v2012_v51  ;;  %v2196_v0 = vld [vmem:[#allocation10 + $0xd4] sm:$0xf]  ;;  %v2067_v19 = vld [vmem:[#allocation10 + $0xc0] sm:$0xf]  ;;  %v2195_v20 = vld [vmem:[#allocation10 + $0xc4] sm:$0xf0] }
 0x123   : > { %v902_v23 = vadd.f32 %v2741_v3, %v871_v25  ;;  %v880_v41 = vrot.slane %v879_v27, 2  ;;  %1431 = vmatpush.bf16.msra.mxu3 %v2096_v42  ;;  %v1512_v59 = vrot.slane %v2813_v63, 2  ;;  %1420 = vmatpush.bf16.msra.mxu2 %v2016_v52  ;;  %v2004_v61 = vor.u32 %v2179_v40, %v2003_v39  ;;  %v2176_v63 = vld [vmem:[#allocation10 + $0x34] sm:$0xf]  ;;  %v2194_v32 = vld [vmem:[#allocation10 + $0xc4] sm:$0xf] }
 0x124   : > { %v903_v50 = vadd.f32 %v2739_v46, %v877_v34  ;;  %v2008_v62 = vor.u32 %v2178_v43, %v2005_v44  ;;  %v2077_v46 = vld [vmem:[#allocation10 + $0xd8] sm:$0xf0]  ;;  %v2833_v1 = vunpack.c.l.b16 %v932_v38  ;;  %v2076_v4 = vor.u32 %v2197_v53, %v2075_v56  ;;  %v2069_v40 = vld [vmem:[#allocation10 + $0xc8] sm:$0xf0]  ;;  %v1987_v38 = vld [vmem:[#allocation10 + $0x20] sm:$0xf] }
 0x125   : > { %v918_v54 = vmax.f32 %v902_v23, 0.0  ;;  %v881_v55 = vmax.f32 %v879_v27, %v880_v41  ;;  %v989_v16 = vrot.slane %v2829_v48, 2  ;;  %v2080_v18 = vor.u32 %v2196_v0, %v2077_v46  ;;  %v1989_v41 = vld [vmem:[#allocation10 + $0x28] sm:$0xf0]  ;;  %v2059_v48 = vld [vmem:[#allocation10 + $0xb0] sm:$0xf] }
 0x126   : > { %v919_v60 = vmax.f32 %v903_v50, 0.0  ;;  %1406 = vmatpush.bf16.msra.mxu1 %v2084_v57  ;;  %1395 = vmatpush.bf16.msra.mxu0 %v2004_v61  ;;  %v985_v27 = vsel %vm984_vm3, %v983_v14, %v2794_v12  ;;  %v1513_v28 = vsel %vm990_vm5, %v1512_v59, %v2803_v31  ;;  %v1996_v39 = vor.u32 %v2177_v9, %v1995_v8  ;;  %v2193_v50 = vld [vmem:[#allocation10 + $0xb4] sm:$0xf0]  ;;  %v1979_v57 = vld [vmem:[#allocation10 + $0x10] sm:$0xf] }
 0x127   : > { %v934_v2 = vpack.c.bf16 %v918_v54, %v918_v54  ;;  %v1526_v5 = vrot.slane %v918_v54, 2  ;;  %v882_v6 = vrot.slane %v881_v55, 1  ;;  %1432 = vmatpush.bf16.msra.mxu3 %v2088_v58  ;;  %1421 = vmatpush.bf16.msra.mxu2 %v2008_v62  ;;  %v988_v12 = vsel %vm987_vm4, %v986_v33, %v985_v27  ;;  %v2192_v54 = vld [vmem:[#allocation10 + $0xb4] sm:$0xf]  ;;  %v2173_v58 = vld [vmem:[#allocation10 + $0x14] sm:$0xf0] }
 0x128   : > { %v935_v10 = vpack.c.bf16 %v919_v60, %v919_v60  ;;  %v1514_v11 = vrot.slane %v919_v60, 1  ;;  %v2000_v31 = vor.u32 %v2176_v63, %v1997_v13  ;;  %v2068_v14 = vor.u32 %v2195_v20, %v2067_v19  ;;  %v2172_v60 = vld [vmem:[#allocation10 + $0x14] sm:$0xf]  ;;  %v1981_v61 = vld [vmem:[#allocation10 + $0x18] sm:$0xf0] }
 0x129   : > { %v883_v17 = vmax.f32 %v881_v55, %v882_v6  ;;  %v1527_v29 = vsel %vm990_vm5, %v1526_v5, %v2823_v24  ;;  %v2844_v34 = vunpack.c.l.b16 %v934_v2  ;;  %v2174_v24 = vld [vmem:[#allocation10 + $0x24] sm:$0xf]  ;;  %v1001_v42 = vrot.slane %v2820_v21, 4  ;;  %v2191_v5 = vld [vmem:[#allocation10 + $0xa4] sm:$0xf0] }
 0x12a   : > { %v972_v25 = vunpack.c.l.b16 %v935_v10  ;;  %v2848_v37 = vsel %vm993_vm6, %v1514_v11, %v1513_v28  ;;  %1407 = vmatpush.bf16.msra.mxu1 %v2076_v4  ;;  %v991_v44 = vsel %vm990_vm5, %v989_v16, %v988_v12  ;;  %v1003_v45 = vrot.slane %v2833_v1, 3  ;;  %1396 = vmatpush.bf16.msra.mxu0 %v1996_v39  ;;  %v2190_v6 = vld [vmem:[#allocation10 + $0xa4] sm:$0xf]  ;;  %v1971_v10 = vld [vmem:[#allocation10] sm:$0xf] }
 0x12b   : > { %v904_v36 = vadd.f32 %v2741_v3, %v883_v17  ;;  %v996_v3 = vsel %vm975_vm0, %v995_v35, %v2761_v49  ;;  %1433 = vmatpush.bf16.msra.mxu3 %v2080_v18  ;;  %1422 = vmatpush.bf16.msra.mxu2 %v2000_v31  ;;  %v2072_v51 = vor.u32 %v2194_v32, %v2069_v40  ;;  %v1005_v53 = vrot.slane %v2844_v34, 2  ;;  %v2171_v11 = vld [vmem:[#allocation10 + $0x4] sm:$0xf0]  ;;  %v2170_v63 = vld [vmem:[#allocation10 + $0x4] sm:$0xf] }
 0x12c   : > { %v992_v23 = vrot.slane %v972_v25, 1  ;;  %v1988_v52 = vor.u32 %v2175_v30, %v1987_v38  ;;  %v1992_v21 = vor.u32 %v2174_v24, %v1989_v41  ;;  %v998_v56 = vsel %vm978_vm1, %v997_v47, %v996_v3  ;;  %v1973_v13 = vld [vmem:[#allocation10 + $0x8] sm:$0xf0]  ;;  %v2043_v25 = vld [vmem:[#allocation10 + $0x90] sm:$0xf] }
 0x12d   : > { %v920_v43 = vmax.f32 %v904_v36, 0.0  ;;  %v2060_v59 = vor.u32 %v2193_v50, %v2059_v48  ;;  %v1000_v62 = vsel %vm981_vm2, %v999_v7, %v998_v56  ;;  %v2064_v1 = vor.u32 %v2192_v54, %v2061_v15  ;;  %v2189_v27 = vld [vmem:[#allocation10 + $0x94] sm:$0xf0]  ;;  %v2045_v32 = vld [vmem:[#allocation10 + $0x98] sm:$0xf0] }
 0x12e   : > { %v994_v33 = vsel %vm993_vm6, %v992_v23, %v991_v44  ;;  %1408 = vmatpush.bf16.msra.mxu1 %v2068_v14  ;;  %1397 = vmatpush.bf16.msra.mxu0 %v1988_v52  ;;  %v1002_v47 = vsel %vm984_vm3, %v1001_v42, %v1000_v62  ;;  %v1980_v2 = vor.u32 %v2173_v58, %v1979_v57  ;;  %v2035_v39 = vld [vmem:[#allocation10 + $0x80] sm:$0xf]  ;;  %v2187_v40 = vld [vmem:[#allocation10 + $0x84] sm:$0xf0]  ;;  %v2186_v38 = vld [vmem:[#allocation10 + $0x84] sm:$0xf] }
 0x12f   : > { %v936_v55 = vpack.c.bf16 %v920_v43, %v920_v43  ;;  %v1528_v49 = vrot.slane %v920_v43, 1  ;;  %v2861_v35 = vpack.c.b16 %v994_v33, %v994_v33  ;;  %1434 = vmatpush.bf16.msra.mxu3 %v2072_v51  ;;  %1423 = vmatpush.bf16.msra.mxu2 %v1992_v21  ;;  %v1004_v7 = vsel %vm987_vm4, %v1003_v45, %v1002_v47  ;;  %v2037_v30 = vld [vmem:[#allocation10 + $0x88] sm:$0xf0]  ;;  %v463_v44 = vld [vmem:[%s2928_s6] sm:$0x3] }
 0x130   : > { %v1984_v9 = vor.u32 %v2172_v60, %v1981_v61  ;;  %v1006_v4 = vsel %vm990_vm5, %v1005_v53, %v1004_v7  ;;  %v2052_v17 = vor.u32 %v2191_v5, %v2051_v26  ;;  %v2056_v19 = vor.u32 %v2190_v6, %v2053_v22 }
 0x131   : > { %v973_v0 = vunpack.c.l.b16 %v936_v55  ;;  %1181 = vmatmul.bf16.vlgmr.msrb.gmra.mxu0 %v2861_v35  ;;  %v2872_v46 = vsel %vm993_vm6, %v1528_v49, %v1527_v29  ;;  %1207 = vmatmul.bf16.vlgmr.msrb.gmra.mxu2 %v2861_v35  ;;  %v1972_v20 = vor.u32 %v2171_v11, %v1971_v10  ;;  %v1976_v28 = vor.u32 %v2170_v63, %v1973_v13  ;;  %v2188_v29 = vld [vmem:[#allocation10 + $0x94] sm:$0xf] }
 0x132   : > { %1409 = vmatpush.bf16.msra.mxu1 %v2060_v59  ;;  %1398 = vmatpush.bf16.msra.mxu0 %v1980_v2  ;;  %v2044_v34 = vor.u32 %v2189_v27, %v2043_v25  ;;  %v2048_v36 = vor.u32 %v2188_v29, %v2045_v32  ;;  %v2036_v23 = vor.u32 %v2187_v40, %v2035_v39  ;;  %v1228_v50 = vperm.slane %v463_v44, 0 }
 0x133   : > { %v1007_v8 = vrot.slane %v973_v0, 1  ;;  %1435 = vmatpush.bf16.msra.mxu3 %v2064_v1  ;;  %1424 = vmatpush.bf16.msra.mxu2 %v1984_v9  ;;  %v2040_v12 = vor.u32 %v2186_v38, %v2037_v30  ;;  %v1229_v15 = vperm.slane %v463_v44, 1  ;;  %v462_v0 = vld [vmem:[%s2926_s4] sm:$0x3] }
 0x134   : > { %v938_v1 = vperm.slane %v462_v0, 0  ;;  %v939_v11 = vperm.slane %v462_v0, 1 }
 0x135   : > { %v1008_v16 = vsel %vm993_vm6, %v1007_v8, %v1006_v4 }
 0x136   : > { %v1010_v18 = vpack.c.b16 %v1008_v16, %v1008_v16  ;;  %1410 = vmatpush.bf16.msra.mxu1 %v2052_v17  ;;  %1399 = vmatpush.bf16.msra.mxu0 %v1972_v20 }
 0x137   : > { %1436 = vmatpush.bf16.msra.mxu3 %v2056_v19  ;;  %1425 = vmatpush.bf16.msra.mxu2 %v1976_v28 }
 0x138   : > { %1194 = vmatmul.bf16.vlgmr.msrb.gmra.mxu1 %v1010_v18  ;;  %1220 = vmatmul.bf16.vlgmr.msrb.gmra.mxu3 %v1010_v18 }
 0x13a   : > { %1411 = vmatpush.bf16.msra.mxu1 %v2044_v34 }
 0x13b   : > { %1437 = vmatpush.bf16.msra.mxu3 %v2048_v36 }
 0x13e   : > { %1412 = vmatpush.bf16.msra.mxu1 %v2036_v23 }
 0x13f   : > { %1438 = vmatpush.bf16.msra.mxu3 %v2040_v12 }
 0x141   : > { %1400 = vmatmul.bf16.vlgmr.msra.gmra.mxu0 %v2861_v35  ;;  %1426 = vmatmul.bf16.vlgmr.msra.gmra.mxu2 %v2861_v35 }
 0x148   : > { %1413 = vmatmul.bf16.vlgmr.msra.gmra.mxu1 %v1010_v18  ;;  %1439 = vmatmul.bf16.vlgmr.msra.gmra.mxu3 %v1010_v18 }
 0x1ae   : > { %v1182_v31 = vpop.f32.mrf.mxu0 }
 0x1af   : > { %v1183_v6 = vadd.f32 %v1182_v31, %v938_v1 }
 0x1b4   : > { %v1208_v14 = vpop.f32.mrf.mxu2 }
 0x1b5   : > { %v1195_v24 = vpop.f32.mrf.mxu1  ;;  %v1209_v19 = vadd.f32 %v1208_v14, %v939_v11 }
 0x1b6   : > { %v1184_v41 = vpop.f32.mrf.mxu0  ;;  %v1196_v10 = vadd.f32 %v1195_v24, %v1183_v6 }
 0x1b8   : > { %v1225_v18 = vmax.f32 %v1196_v10, 0.0 }
 0x1bb   : > { %v1221_v3 = vpop.f32.mrf.mxu3 }
 0x1bc   : > { %v1210_v42 = vpop.f32.mrf.mxu2  ;;  %v1222_v32 = vadd.f32 %v1221_v3, %v1209_v19 }
 0x1bd   : > { %v1197_v43 = vpop.f32.mrf.mxu1 }
 0x1be   : > { %v1401_v48 = vpop.f32.mrf.mxu0  ;;  %v1226_v12 = vmax.f32 %v1222_v32, 0.0 }
 0x1bf   : > { %v1402_v33 = vadd.f32 %v1401_v48, %v1228_v50 }
 0x1c3   : > { %v1223_v45 = vpop.f32.mrf.mxu3 }
 0x1c4   : > { %v1427_v51 = vpop.f32.mrf.mxu2 }
 0x1c5   : > { %v1414_v52 = vpop.f32.mrf.mxu1  ;;  %v1428_v35 = vadd.f32 %v1427_v51, %v1229_v15 }
 0x1c6   : > { %v1415_v54 = vadd.f32 %v1414_v52, %v1402_v33  ;;  %v1403_v55 = vpop.f32.mrf.mxu0 }
 0x1c8   : > { %v2097_v49 = vmul.f32 -1.442695, %v1415_v54 }
 0x1ca   : > { %2300 = vpow2.f32 %v2097_v49 }
 0x1cb   : > { %v1440_v21 = vpop.f32.mrf.mxu3 }
 0x1cc   : > { %v1441_v57 = vadd.f32 %v1440_v21, %v1428_v35  ;;  %v1429_v58 = vpop.f32.mrf.mxu2 }
 0x1cd   : > { %v1416_v56 = vpop.f32.mrf.mxu1 }
 0x1ce   : > { %v2098_v53 = vmul.f32 -1.442695, %v1441_v57 }
 0x1d0   : > { %v2301_v59 = vpop.eup %2300  ;;  %2302 = vpow2.f32 %v2098_v53 }
 0x1d1   : > { %v1450_v60 = vadd.f32 1.0, %v2301_v59 }
 0x1d3   : > { %2304 = vrcp.f32 %v1450_v60  ;;  %v1442_v61 = vpop.f32.mrf.mxu3  ;;  %v1463_v22 = vand.u32 2147483648, %v1450_v60  ;;  %v1461_v7 = vand.u32 2147483647, %v1450_v60  ;;  %vm1457_vm8 = vweird.f32 %v1450_v60 }
 0x1d5   : > { %v1464_v13 = vor.u32 1.1754944e-38, %v1463_v22  ;;  %vm1462_vm10 = vcmp.eq.f32.partialorder %v1461_v7, 8.507059e+37 }
 0x1d6   : > { %v2303_v62 = vpop.eup %2302 }
 0x1d7   : > { %v1451_v26 = vadd.f32 1.0, %v2303_v62 }
 0x1d9   : > { %v2305_v47 = vpop.eup %2304  ;;  %2306 = vrcp.f32 %v1451_v26  ;;  %v1478_v20 = vand.u32 2147483648, %v1451_v26  ;;  %v1476_v28 = vand.u32 2147483647, %v1451_v26  ;;  %vm1472_vm12 = vweird.f32 %v1451_v26 }
 0x1da   : > { %v1453_v2 = vmul.f32 %v2305_v47, %v1450_v60  ;;  %vm1458_vm7 = vweird.f32 %v2305_v47 }
 0x1db   : > { %vm1459_vm9 = vmor %vm1457_vm8, %vm1458_vm7  ;;  %v1479_v40 = vor.u32 1.1754944e-38, %v1478_v20  ;;  %vm1477_vm14 = vcmp.eq.f32.partialorder %v1476_v28, 8.507059e+37 }
 0x1dc   : > { %v1454_v5 = vsub.f32 1.0, %v1453_v2 }
 0x1de   : > { %v1455_v8 = vmul.f32 %v2305_v47, %v1454_v5 }
 0x1df   : > { %v2307_v9 = vpop.eup %2306 }
 0x1e0   : > { %v1456_v4 = vadd.f32 %v2305_v47, %v1455_v8  ;;  %v1468_v63 = vmul.f32 %v2307_v9, %v1451_v26  ;;  %vm1473_vm11 = vweird.f32 %v2307_v9 }
 0x1e1   : > { %vm1474_vm13 = vmor %vm1472_vm12, %vm1473_vm11 }
 0x1e2   : > { %v1469_v16 = vsub.f32 1.0, %v1468_v63  ;;  %v1460_v17 = vsel %vm1459_vm9, %v2305_v47, %v1456_v4 }
 0x1e3   : > { %v1465_v25 = vsel %vm1462_vm10, %v1464_v13, %v1460_v17 }
 0x1e4   : > { %v1470_v27 = vmul.f32 %v2307_v9, %v1469_v16  ;;  %v1484_v29 = vsub.f32 1.0, %v1465_v25  ;;  %v1482_v36 = vmul.f32 %v1465_v25, %v1225_v18 }
 0x1e6   : > { %v1471_v34 = vadd.f32 %v2307_v9, %v1470_v27  ;;  %v1532_v39 = vmul.f32 %v2848_v37, %v1484_v29 }
 0x1e8   : > { %v1475_v38 = vsel %vm1474_vm13, %v2307_v9, %v1471_v34  ;;  %v1534_v30 = vadd.f32 %v1532_v39, %v1482_v36 }
 0x1e9   : > { %v1480_v23 = vsel %vm1477_vm14, %v1479_v40, %v1475_v38 }
 0x1ea   : > { %v1485_v31 = vsub.f32 1.0, %v1480_v23  ;;  %1536 = vst [vmem:[%s363_s28] sm:$0xff] %v1534_v30  ;;  %v1483_v14 = vmul.f32 %v1480_v23, %v1226_v12 }
 0x1ec   : > { %v1533_v37 = vmul.f32 %v2872_v46, %v1485_v31 }
 0x1ee   : > { %v1535_v24 = vadd.f32 %v1533_v37, %v1483_v14 }
 0x1f0   : > { %1537 = vst [vmem:[%s363_s28 + $0x8] sm:$0xff] %v1535_v24 }
 0x1f1   : > { %2485 = shalt.err (!%p2482_p10)
}
 0x1f2   : > { %2229 = dma.vmem_to_hbm [thread:$0]  (%p2672_p0), %s1553_s15, 256, %s1555_s17, %s1539_s20  }
 0x1f3 PF: > { %p2261_p11 = scmp.ge.s32.totalorder %s2532_s27, 2  ;;  %s1566_s11 = sand.u32 1, %s2520_s24  }
 0x1f4   : > { %s1567_s22 = scalar_lea.sflag [#allocation4], %s1566_s11 }
 0x1f5   : > { %p2249_p12 = pnand %p2261_p11, %p2615_p6 }
 0x1f7   : > { %p2250_p13 = pneg %p2249_p12 }
 0x1f9   : > { %2515 = dma.done.wait (%p2250_p13), %s1567_s22, 256  }
 0x1fa   : > { %2517 = vsyncadd (%p2250_p13), %s1567_s22, 4294967040  ;;  %p22_p3 = scmp.ge.s32.totalorder %s2662_s18, 5   ;;  %s2942_s24 = smov %s2524_s25 }
 0x1fb   : > { %s2943_s25 = smov %s2528_s26  ;;  %s2944_s26 = smov %s2678_s9 }
 0x1fc   : > { %s2945_s27 = smov %s2662_s18  ;;  %24 = sbr.rel (!%p22_p3) target bundleno = 9 (0x9), region = 109 }
 0x201   :  { %1573 = vsyncpa [#allocation3], 1 }
 0x202   :  { %1575 = vsyncpa [#allocation3 + $0x1], 1 }
 0x203   :  { %1576 = vsyncpa [#allocation6], 1 }
 0x204   :  { %1577 = vsyncpa [#allocation9], 1 }
 0x205   :  { %1578 = vsyncpa [#allocation4], 1 }
 0x206   :  { %1580 = vsyncpa [#allocation4 + $0x1], 1 }

</bundles_post_ra>
